<compile_context>
chip_gen: v7x
topology: tpu7x:2x2x1
jax: 0.10.0
libtpu: 0.0.40
codegen_flags: <defaults>
</compile_context>

<pallas_src>
import functools

import jax
import jax.numpy as jnp
from jax.experimental import pallas as pl
from jax.experimental.pallas import tpu as pltpu

# --- hyperparameters mirroring the module's __init__ defaults -----------------
WEIGHT_CE = 1.0
WEIGHT_TVERSKY = 1.0
ALPHA = 0.3          # Tversky false-positive weight (assumed default)
BETA = 0.7           # Tversky false-negative weight
SMOOTH = 1e-5
LANE = 128
ROW_ALIGN = 32       # int8 label tiles use the native (32, 128) layout


def _round_up(x, m):
    return -(-x // m) * m


def _region_tversky_ce_kernel(logits_ref, target_ref,
                              tp_ref, sp_ref, cnt_ref, ce_ref,
                              *, num_classes):
    """One spatial tile: channel-unrolled softmax + masked partial reductions.

    Outputs are per-parallel-block, lane-resident (B, 128) partial sums; the
    scalar Tversky / CE epilogue happens in the JAX wrapper.
    """
    t = pl.program_id(1)   # reduction axis (last, "arbitrary")

    @pl.when(t == 0)
    def _init():
        tp_ref[...] = jnp.zeros_like(tp_ref)
        sp_ref[...] = jnp.zeros_like(sp_ref)
        cnt_ref[...] = jnp.zeros_like(cnt_ref)
        ce_ref[...] = jnp.zeros_like(ce_ref)

    C = num_classes
    x = logits_ref[...]                                 # (B, C, TR, 128) native dtype
    tgt = target_ref[...].astype(jnp.int32)             # (B, TR, 128), widened from int8

    # ---- channel-unrolled softmax (f32 cast happens per tile, in-kernel) ---
    chans = [x[:, c].astype(jnp.float32) for c in range(C)]   # each (B, TR, 128)
    m = chans[0]
    for c in range(1, C):
        m = jnp.maximum(m, chans[c])
    shifted = [xc - m for xc in chans]
    exps = [jnp.exp(s) for s in shifted]
    denom = exps[0]
    for c in range(1, C):
        denom = denom + exps[c]
    inv = pl.reciprocal(denom, approx=False)             # one reciprocal, C multiplies

    # CE per pixel: -log p_t = log(denom) - shifted_t.  Padded pixels
    # (all-zero logits, label -1) contribute exactly log(C); the wrapper
    # removes that analytically, so no validity mask is needed in the hot loop.
    ce_part = jnp.log(denom)

    # ---- per-class tp / sum_probs / count + fused CE, lane-resident --------
    for c in range(C):
        mask_c = (tgt == c).astype(jnp.float32)
        p_c = exps[c] * inv
        tp_ref[0, c] = tp_ref[0, c] + jnp.sum(mask_c * p_c, axis=1)   # (B, 128)
        sp_ref[0, c] = sp_ref[0, c] + jnp.sum(p_c, axis=1)            # incl. pads (1/C each)
        cnt_ref[0, c] = cnt_ref[0, c] + jnp.sum(mask_c, axis=1)
        ce_part = ce_part - mask_c * shifted[c]
    ce_ref[0] = ce_ref[0] + jnp.sum(ce_part, axis=1)                  # (B, 128)


@functools.partial(jax.jit, static_argnames=("max_tile_rows",))
def region_tversky_ce_loss(net_output, target, max_tile_rows=None):
    """net_output: (B, C, H, W) float logits (any float dtype).
    target: (B, 1, H, W) integer labels (num_classes must fit in int8)."""
    B, C, H, W = net_output.shape
    S = H * W

    # ---- static tiling: spatial -> (rows, 128) lanes -------------------------
    itemsize = jnp.dtype(net_output.dtype).itemsize
    budget_bytes = 2 << 20                       # ~2 MiB of logits per pipeline buffer
    rows = max(ROW_ALIGN,
               (budget_bytes // (B * C * LANE * itemsize)) // ROW_ALIGN * ROW_ALIGN)
    if max_tile_rows is not None:
        rows = max(ROW_ALIGN, min(rows, _round_up(max_tile_rows, ROW_ALIGN)))
    r_raw = -(-S // LANE)
    tile_r = min(rows, _round_up(r_raw, ROW_ALIGN))
    num_tiles = -(-r_raw // tile_r)
    num_blocks = 2 if num_tiles >= 2 else 1      # megacore "parallel" axis (v7x)
    tiles_per_block = -(-num_tiles // num_blocks)
    r_pad = num_blocks * tiles_per_block * tile_r
    s_pad = r_pad * LANE
    n_pad = s_pad - S                            # padded pixels per batch row

    # No wrapper up-cast of the logits: cast happens per tile inside the kernel.
    logits = net_output.reshape(B, C, S)
    tgt = target[:, 0].reshape(B, S).astype(jnp.int8)   # labels fit in int8
    if n_pad:
        logits = jnp.pad(logits, ((0, 0), (0, 0), (0, n_pad)))
        tgt = jnp.pad(tgt, ((0, 0), (0, n_pad)), constant_values=-1)
    logits = logits.reshape(B, C, r_pad, LANE)
    tgt = tgt.reshape(B, r_pad, LANE)

    kernel = functools.partial(_region_tversky_ce_kernel, num_classes=C)

    tp_p, sp_p, cnt_p, ce_p = pl.pallas_call(
        kernel,
        out_shape=(
            jax.ShapeDtypeStruct((num_blocks, C, B, LANE), jnp.float32),  # tp partials
            jax.ShapeDtypeStruct((num_blocks, C, B, LANE), jnp.float32),  # sum(probs)
            jax.ShapeDtypeStruct((num_blocks, C, B, LANE), jnp.float32),  # class counts
            jax.ShapeDtypeStruct((num_blocks, B, LANE), jnp.float32),     # CE partials
        ),
        grid_spec=pltpu.PrefetchScalarGridSpec(
            num_scalar_prefetch=0,
            grid=(num_blocks, tiles_per_block),
            in_specs=[
                pl.BlockSpec((B, C, tile_r, LANE),
                             lambda p, t: (0, 0, p * tiles_per_block + t, 0)),
                pl.BlockSpec((B, tile_r, LANE),
                             lambda p, t: (0, p * tiles_per_block + t, 0)),
            ],
            out_specs=[
                pl.BlockSpec((1, C, B, LANE), lambda p, t: (p, 0, 0, 0)),
                pl.BlockSpec((1, C, B, LANE), lambda p, t: (p, 0, 0, 0)),
                pl.BlockSpec((1, C, B, LANE), lambda p, t: (p, 0, 0, 0)),
                pl.BlockSpec((1, B, LANE), lambda p, t: (p, 0, 0)),
            ],
        ),
        compiler_params=pltpu.CompilerParams(
            dimension_semantics=("parallel", "arbitrary"),
            vmem_limit_bytes=32 * 1024 * 1024,
        ),
    )(logits, tgt)

    # ---- tiny epilogue in plain JAX: cross-lane/block reduce + scalar math ----
    tp = jnp.sum(tp_p, axis=(0, 3))          # (C, B)
    sp = jnp.sum(sp_p, axis=(0, 3))          # (C, B), still includes padded pixels
    cnt = jnp.sum(cnt_p, axis=(0, 3))        # (C, B)
    ce_sum = jnp.sum(ce_p)

    if n_pad:
        # Padded pixels have all-zero logits: softmax = 1/C per class, CE = log(C).
        sp = sp - (n_pad / C)
        ce_sum = ce_sum - (B * n_pad) * jnp.log(jnp.float32(C))

    fp = sp - tp                              # == sum(probs * (1 - onehot))
    fn = cnt - tp                             # == sum((1 - probs) * onehot)
    tversky = (tp + SMOOTH) / (tp + ALPHA * fp + BETA * fn + SMOOTH)
    tversky_loss = -jnp.mean(tversky)
    ce_loss = ce_sum / float(B * S)
    return WEIGHT_CE * ce_loss + WEIGHT_TVERSKY * tversky_loss


def _reference(net_output, target):
    """Pure-JAX mirror of the PyTorch forward for a correctness check."""
    B, C, H, W = net_output.shape
    logits = net_output.astype(jnp.float32)
    logp = jax.nn.log_softmax(logits, axis=1)
    probs = jnp.exp(logp)
    t = target[:, 0].astype(jnp.int32)
    onehot = jax.nn.one_hot(t, C, axis=1, dtype=jnp.float32)        # (B, C, H, W)
    ce_loss = -jnp.mean(jnp.sum(onehot * logp, axis=1))
    tp = jnp.sum(probs * onehot, axis=(2, 3))
    fp = jnp.sum(probs * (1.0 - onehot), axis=(2, 3))
    fn = jnp.sum((1.0 - probs) * onehot, axis=(2, 3))
    tversky = (tp + SMOOTH) / (tp + ALPHA * fp + BETA * fn + SMOOTH)
    return WEIGHT_CE * ce_loss + WEIGHT_TVERSKY * (-jnp.mean(tversky))


if __name__ == "__main__":
    key = jax.random.PRNGKey(0)
    k1, k2, k3, k4 = jax.random.split(key, 4)

    # --- shape from the module spec (single grid step, heavy padding path) ----
    B, C, H, W = 2, 4, 16, 16
    net_output = jax.random.normal(k1, (B, C, H, W), dtype=jnp.float32)
    target = jax.random.randint(k2, (B, 1, H, W), 0, C, dtype=jnp.int32)

    loss = region_tversky_ce_loss(net_output, target)
    jax.block_until_ready(loss)
    ref = _reference(net_output, target)
    assert jnp.allclose(loss, ref, rtol=1e-4, atol=1e-5), (loss, ref)

    # --- second shape: multi-step accumulation, 2-way parallel axis, padding ---
    B2, C2, H2, W2 = 2, 4, 120, 120           # S=14400 -> 4 row tiles, 2 parallel blocks
    net2 = jax.random.normal(k3, (B2, C2, H2, W2), dtype=jnp.float32)
    tgt2 = jax.random.randint(k4, (B2, 1, H2, W2), 0, C2, dtype=jnp.int32)

    loss2 = region_tversky_ce_loss(net2, tgt2, max_tile_rows=32)
    jax.block_until_ready(loss2)
    ref2 = _reference(net2, tgt2)
    assert jnp.allclose(loss2, ref2, rtol=1e-4, atol=1e-5), (loss2, ref2)

    print("KERNEL_OK")
</pallas_src>

<mosaic_0001>
module attributes {stable_mosaic.version = 11 : i64} {
  func.func @_region_tversky_ce_kernel(%arg0: i32, %arg1: i32, %arg2: memref<2x4x32x128xf32, #tpu.memory_space<vmem>>, %arg3: memref<2x32x128xi8, #tpu.memory_space<vmem>>, %arg4: memref<1x4x2x128xf32, #tpu.memory_space<vmem>>, %arg5: memref<1x4x2x128xf32, #tpu.memory_space<vmem>>, %arg6: memref<1x4x2x128xf32, #tpu.memory_space<vmem>>, %arg7: memref<1x2x128xf32, #tpu.memory_space<vmem>>) attributes {dimension_semantics = [#tpu.dimension_semantics<parallel>, #tpu.dimension_semantics<arbitrary>], iteration_bounds = array<i64: 1, 1>, scalar_prefetch = 0 : i64, scratch_operands = 0 : i64, tpu.core_type = #tpu.core_type<tc>, window_params = [{transform_indices = @transform_0, window_bounds = array<i64: 2, 4, 32, 128>}, {transform_indices = @transform_1, window_bounds = array<i64: 2, 32, 128>}, {transform_indices = @transform_2, window_bounds = array<i64: 1, 4, 2, 128>}, {transform_indices = @transform_3, window_bounds = array<i64: 1, 4, 2, 128>}, {transform_indices = @transform_4, window_bounds = array<i64: 1, 4, 2, 128>}, {transform_indices = @transform_5, window_bounds = array<i64: 1, 2, 128>}]} {
    %c0_i32 = arith.constant 0 : i32
    %0 = arith.cmpi eq, %arg1, %c0_i32 : i32
    %1 = arith.extui %0 : i1 to i32
    %c0_i32_0 = arith.constant 0 : i32
    %2 = arith.cmpi ne, %1, %c0_i32_0 : i32
    scf.if %2 {
      %cst_119 = arith.constant 0.000000e+00 : f32
      %153 = vector.broadcast %cst_119 : f32 to vector<1x4x2x128xf32>
      %c0_120 = arith.constant 0 : index
      %c0_121 = arith.constant 0 : index
      %c0_122 = arith.constant 0 : index
      %c0_123 = arith.constant 0 : index
      %154 = vector.load %arg4[%c0_120, %c0_121, %c0_122, %c0_123] : memref<1x4x2x128xf32, #tpu.memory_space<vmem>>, vector<1x4x2x128xf32>
      tpu.vector_store %arg4[%c0_120, %c0_121, %c0_122, %c0_123], %153 {strides = array<i32>} : memref<1x4x2x128xf32, #tpu.memory_space<vmem>>, vector<1x4x2x128xf32>,
      %cst_124 = arith.constant 0.000000e+00 : f32
      %155 = vector.broadcast %cst_124 : f32 to vector<1x4x2x128xf32>
      %c0_125 = arith.constant 0 : index
      %c0_126 = arith.constant 0 : index
      %c0_127 = arith.constant 0 : index
      %c0_128 = arith.constant 0 : index
      %156 = vector.load %arg5[%c0_125, %c0_126, %c0_127, %c0_128] : memref<1x4x2x128xf32, #tpu.memory_space<vmem>>, vector<1x4x2x128xf32>
      tpu.vector_store %arg5[%c0_125, %c0_126, %c0_127, %c0_128], %155 {strides = array<i32>} : memref<1x4x2x128xf32, #tpu.memory_space<vmem>>, vector<1x4x2x128xf32>,
      %cst_129 = arith.constant 0.000000e+00 : f32
      %157 = vector.broadcast %cst_129 : f32 to vector<1x4x2x128xf32>
      %c0_130 = arith.constant 0 : index
      %c0_131 = arith.constant 0 : index
      %c0_132 = arith.constant 0 : index
      %c0_133 = arith.constant 0 : index
      %158 = vector.load %arg6[%c0_130, %c0_131, %c0_132, %c0_133] : memref<1x4x2x128xf32, #tpu.memory_space<vmem>>, vector<1x4x2x128xf32>
      tpu.vector_store %arg6[%c0_130, %c0_131, %c0_132, %c0_133], %157 {strides = array<i32>} : memref<1x4x2x128xf32, #tpu.memory_space<vmem>>, vector<1x4x2x128xf32>,
      %cst_134 = arith.constant 0.000000e+00 : f32
      %159 = vector.broadcast %cst_134 : f32 to vector<1x2x128xf32>
      %c0_135 = arith.constant 0 : index
      %c0_136 = arith.constant 0 : index
      %c0_137 = arith.constant 0 : index
      %160 = vector.load %arg7[%c0_135, %c0_136, %c0_137] : memref<1x2x128xf32, #tpu.memory_space<vmem>>, vector<1x2x128xf32>
      tpu.vector_store %arg7[%c0_135, %c0_136, %c0_137], %159 {strides = array<i32>} : memref<1x2x128xf32, #tpu.memory_space<vmem>>, vector<1x2x128xf32>,
    } else {
    }
    %c0 = arith.constant 0 : index
    %c0_1 = arith.constant 0 : index
    %c0_2 = arith.constant 0 : index
    %c0_3 = arith.constant 0 : index
    %3 = vector.load %arg2[%c0, %c0_1, %c0_2, %c0_3] : memref<2x4x32x128xf32, #tpu.memory_space<vmem>>, vector<2x4x32x128xf32>
    %c0_4 = arith.constant 0 : index
    %c0_5 = arith.constant 0 : index
    %c0_6 = arith.constant 0 : index
    %4 = vector.load %arg3[%c0_4, %c0_5, %c0_6] : memref<2x32x128xi8, #tpu.memory_space<vmem>>, vector<2x32x128xi8>
    %5 = arith.extsi %4 : vector<2x32x128xi8> to vector<2x32x128xi32>
    %6 = vector.extract_strided_slice %3 {offsets = [0, 0, 0, 0], sizes = [2, 1, 32, 128], strides = [1, 1, 1, 1]} : vector<2x4x32x128xf32> to vector<2x1x32x128xf32>
    %7 = vector.shape_cast %6 : vector<2x1x32x128xf32> to vector<2x32x128xf32>
    %8 = vector.extract_strided_slice %3 {offsets = [0, 1, 0, 0], sizes = [2, 1, 32, 128], strides = [1, 1, 1, 1]} : vector<2x4x32x128xf32> to vector<2x1x32x128xf32>
    %9 = vector.shape_cast %8 : vector<2x1x32x128xf32> to vector<2x32x128xf32>
    %10 = vector.extract_strided_slice %3 {offsets = [0, 2, 0, 0], sizes = [2, 1, 32, 128], strides = [1, 1, 1, 1]} : vector<2x4x32x128xf32> to vector<2x1x32x128xf32>
    %11 = vector.shape_cast %10 : vector<2x1x32x128xf32> to vector<2x32x128xf32>
    %12 = vector.extract_strided_slice %3 {offsets = [0, 3, 0, 0], sizes = [2, 1, 32, 128], strides = [1, 1, 1, 1]} : vector<2x4x32x128xf32> to vector<2x1x32x128xf32>
    %13 = vector.shape_cast %12 : vector<2x1x32x128xf32> to vector<2x32x128xf32>
    %14 = arith.maximumf %7, %9 : vector<2x32x128xf32>
    %15 = arith.maximumf %14, %11 : vector<2x32x128xf32>
    %16 = arith.maximumf %15, %13 : vector<2x32x128xf32>
    %17 = arith.subf %7, %16 : vector<2x32x128xf32>
    %18 = arith.subf %9, %16 : vector<2x32x128xf32>
    %19 = arith.subf %11, %16 : vector<2x32x128xf32>
    %20 = arith.subf %13, %16 : vector<2x32x128xf32>
    %21 = math.exp %17 : vector<2x32x128xf32>
    %22 = math.exp %18 : vector<2x32x128xf32>
    %23 = math.exp %19 : vector<2x32x128xf32>
    %24 = math.exp %20 : vector<2x32x128xf32>
    %25 = arith.addf %21, %22 : vector<2x32x128xf32>
    %26 = arith.addf %25, %23 : vector<2x32x128xf32>
    %27 = arith.addf %26, %24 : vector<2x32x128xf32>
    %28 = tpu.reciprocal %27 : vector<2x32x128xf32> -> vector<2x32x128xf32>
    %29 = math.log %27 : vector<2x32x128xf32>
    %c0_i32_7 = arith.constant 0 : i32
    %30 = vector.broadcast %c0_i32_7 : i32 to vector<2x32x128xi32>
    %31 = arith.cmpi eq, %5, %30 : vector<2x32x128xi32>
    %32 = arith.extui %31 : vector<2x32x128xi1> to vector<2x32x128xi32>
    %33 = arith.sitofp %32 : vector<2x32x128xi32> to vector<2x32x128xf32>
    %34 = arith.mulf %21, %28 : vector<2x32x128xf32>
    %c0_8 = arith.constant 0 : index
    %c0_9 = arith.constant 0 : index
    %c0_10 = arith.constant 0 : index
    %c0_11 = arith.constant 0 : index
    %35 = vector.load %arg4[%c0_8, %c0_9, %c0_10, %c0_11] : memref<1x4x2x128xf32, #tpu.memory_space<vmem>>, vector<1x1x2x128xf32>
    %36 = vector.shape_cast %35 : vector<1x1x2x128xf32> to vector<2x128xf32>
    %37 = arith.mulf %33, %34 : vector<2x32x128xf32>
    %cst = arith.constant dense<0.000000e+00> : vector<2x128xf32>
    %38 = vector.multi_reduction <add>, %37, %cst [1] : vector<2x32x128xf32> to vector<2x128xf32>
    %39 = arith.addf %36, %38 : vector<2x128xf32>
    %c0_12 = arith.constant 0 : index
    %c0_13 = arith.constant 0 : index
    %c0_14 = arith.constant 0 : index
    %c0_15 = arith.constant 0 : index
    %40 = vector.load %arg4[%c0_12, %c0_13, %c0_14, %c0_15] : memref<1x4x2x128xf32, #tpu.memory_space<vmem>>, vector<1x1x2x128xf32>
    %41 = vector.shape_cast %40 : vector<1x1x2x128xf32> to vector<2x128xf32>
    %42 = vector.shape_cast %39 : vector<2x128xf32> to vector<1x1x2x128xf32>
    tpu.vector_store %arg4[%c0_12, %c0_13, %c0_14, %c0_15], %42 {strides = array<i32>} : memref<1x4x2x128xf32, #tpu.memory_space<vmem>>, vector<1x1x2x128xf32>,
    %c0_16 = arith.constant 0 : index
    %c0_17 = arith.constant 0 : index
    %c0_18 = arith.constant 0 : index
    %c0_19 = arith.constant 0 : index
    %43 = vector.load %arg5[%c0_16, %c0_17, %c0_18, %c0_19] : memref<1x4x2x128xf32, #tpu.memory_space<vmem>>, vector<1x1x2x128xf32>
    %44 = vector.shape_cast %43 : vector<1x1x2x128xf32> to vector<2x128xf32>
    %cst_20 = arith.constant dense<0.000000e+00> : vector<2x128xf32>
    %45 = vector.multi_reduction <add>, %34, %cst_20 [1] : vector<2x32x128xf32> to vector<2x128xf32>
    %46 = arith.addf %44, %45 : vector<2x128xf32>
    %c0_21 = arith.constant 0 : index
    %c0_22 = arith.constant 0 : index
    %c0_23 = arith.constant 0 : index
    %c0_24 = arith.constant 0 : index
    %47 = vector.load %arg5[%c0_21, %c0_22, %c0_23, %c0_24] : memref<1x4x2x128xf32, #tpu.memory_space<vmem>>, vector<1x1x2x128xf32>
    %48 = vector.shape_cast %47 : vector<1x1x2x128xf32> to vector<2x128xf32>
    %49 = vector.shape_cast %46 : vector<2x128xf32> to vector<1x1x2x128xf32>
    tpu.vector_store %arg5[%c0_21, %c0_22, %c0_23, %c0_24], %49 {strides = array<i32>} : memref<1x4x2x128xf32, #tpu.memory_space<vmem>>, vector<1x1x2x128xf32>,
    %c0_25 = arith.constant 0 : index
    %c0_26 = arith.constant 0 : index
    %c0_27 = arith.constant 0 : index
    %c0_28 = arith.constant 0 : index
    %50 = vector.load %arg6[%c0_25, %c0_26, %c0_27, %c0_28] : memref<1x4x2x128xf32, #tpu.memory_space<vmem>>, vector<1x1x2x128xf32>
    %51 = vector.shape_cast %50 : vector<1x1x2x128xf32> to vector<2x128xf32>
    %cst_29 = arith.constant dense<0.000000e+00> : vector<2x128xf32>
    %52 = vector.multi_reduction <add>, %33, %cst_29 [1] : vector<2x32x128xf32> to vector<2x128xf32>
    %53 = arith.addf %51, %52 : vector<2x128xf32>
    %c0_30 = arith.constant 0 : index
    %c0_31 = arith.constant 0 : index
    %c0_32 = arith.constant 0 : index
    %c0_33 = arith.constant 0 : index
    %54 = vector.load %arg6[%c0_30, %c0_31, %c0_32, %c0_33] : memref<1x4x2x128xf32, #tpu.memory_space<vmem>>, vector<1x1x2x128xf32>
    %55 = vector.shape_cast %54 : vector<1x1x2x128xf32> to vector<2x128xf32>
    %56 = vector.shape_cast %53 : vector<2x128xf32> to vector<1x1x2x128xf32>
    tpu.vector_store %arg6[%c0_30, %c0_31, %c0_32, %c0_33], %56 {strides = array<i32>} : memref<1x4x2x128xf32, #tpu.memory_space<vmem>>, vector<1x1x2x128xf32>,
    %57 = arith.mulf %33, %17 : vector<2x32x128xf32>
    %58 = arith.subf %29, %57 : vector<2x32x128xf32>
    %c1_i32 = arith.constant 1 : i32
    %59 = vector.broadcast %c1_i32 : i32 to vector<2x32x128xi32>
    %60 = arith.cmpi eq, %5, %59 : vector<2x32x128xi32>
    %61 = arith.extui %60 : vector<2x32x128xi1> to vector<2x32x128xi32>
    %62 = arith.sitofp %61 : vector<2x32x128xi32> to vector<2x32x128xf32>
    %63 = arith.mulf %22, %28 : vector<2x32x128xf32>
    %c0_34 = arith.constant 0 : index
    %c1 = arith.constant 1 : index
    %c0_35 = arith.constant 0 : index
    %c0_36 = arith.constant 0 : index
    %64 = vector.load %arg4[%c0_34, %c1, %c0_35, %c0_36] : memref<1x4x2x128xf32, #tpu.memory_space<vmem>>, vector<1x1x2x128xf32>
    %65 = vector.shape_cast %64 : vector<1x1x2x128xf32> to vector<2x128xf32>
    %66 = arith.mulf %62, %63 : vector<2x32x128xf32>
    %cst_37 = arith.constant dense<0.000000e+00> : vector<2x128xf32>
    %67 = vector.multi_reduction <add>, %66, %cst_37 [1] : vector<2x32x128xf32> to vector<2x128xf32>
    %68 = arith.addf %65, %67 : vector<2x128xf32>
    %c0_38 = arith.constant 0 : index
    %c1_39 = arith.constant 1 : index
    %c0_40 = arith.constant 0 : index
    %c0_41 = arith.constant 0 : index
    %69 = vector.load %arg4[%c0_38, %c1_39, %c0_40, %c0_41] : memref<1x4x2x128xf32, #tpu.memory_space<vmem>>, vector<1x1x2x128xf32>
    %70 = vector.shape_cast %69 : vector<1x1x2x128xf32> to vector<2x128xf32>
    %71 = vector.shape_cast %68 : vector<2x128xf32> to vector<1x1x2x128xf32>
    tpu.vector_store %arg4[%c0_38, %c1_39, %c0_40, %c0_41], %71 {strides = array<i32>} : memref<1x4x2x128xf32, #tpu.memory_space<vmem>>, vector<1x1x2x128xf32>,
    %c0_42 = arith.constant 0 : index
    %c1_43 = arith.constant 1 : index
    %c0_44 = arith.constant 0 : index
    %c0_45 = arith.constant 0 : index
    %72 = vector.load %arg5[%c0_42, %c1_43, %c0_44, %c0_45] : memref<1x4x2x128xf32, #tpu.memory_space<vmem>>, vector<1x1x2x128xf32>
    %73 = vector.shape_cast %72 : vector<1x1x2x128xf32> to vector<2x128xf32>
    %cst_46 = arith.constant dense<0.000000e+00> : vector<2x128xf32>
    %74 = vector.multi_reduction <add>, %63, %cst_46 [1] : vector<2x32x128xf32> to vector<2x128xf32>
    %75 = arith.addf %73, %74 : vector<2x128xf32>
    %c0_47 = arith.constant 0 : index
    %c1_48 = arith.constant 1 : index
    %c0_49 = arith.constant 0 : index
    %c0_50 = arith.constant 0 : index
    %76 = vector.load %arg5[%c0_47, %c1_48, %c0_49, %c0_50] : memref<1x4x2x128xf32, #tpu.memory_space<vmem>>, vector<1x1x2x128xf32>
    %77 = vector.shape_cast %76 : vector<1x1x2x128xf32> to vector<2x128xf32>
    %78 = vector.shape_cast %75 : vector<2x128xf32> to vector<1x1x2x128xf32>
    tpu.vector_store %arg5[%c0_47, %c1_48, %c0_49, %c0_50], %78 {strides = array<i32>} : memref<1x4x2x128xf32, #tpu.memory_space<vmem>>, vector<1x1x2x128xf32>,
    %c0_51 = arith.constant 0 : index
    %c1_52 = arith.constant 1 : index
    %c0_53 = arith.constant 0 : index
    %c0_54 = arith.constant 0 : index
    %79 = vector.load %arg6[%c0_51, %c1_52, %c0_53, %c0_54] : memref<1x4x2x128xf32, #tpu.memory_space<vmem>>, vector<1x1x2x128xf32>
    %80 = vector.shape_cast %79 : vector<1x1x2x128xf32> to vector<2x128xf32>
    %cst_55 = arith.constant dense<0.000000e+00> : vector<2x128xf32>
    %81 = vector.multi_reduction <add>, %62, %cst_55 [1] : vector<2x32x128xf32> to vector<2x128xf32>
    %82 = arith.addf %80, %81 : vector<2x128xf32>
    %c0_56 = arith.constant 0 : index
    %c1_57 = arith.constant 1 : index
    %c0_58 = arith.constant 0 : index
    %c0_59 = arith.constant 0 : index
    %83 = vector.load %arg6[%c0_56, %c1_57, %c0_58, %c0_59] : memref<1x4x2x128xf32, #tpu.memory_space<vmem>>, vector<1x1x2x128xf32>
    %84 = vector.shape_cast %83 : vector<1x1x2x128xf32> to vector<2x128xf32>
    %85 = vector.shape_cast %82 : vector<2x128xf32> to vector<1x1x2x128xf32>
    tpu.vector_store %arg6[%c0_56, %c1_57, %c0_58, %c0_59], %85 {strides = array<i32>} : memref<1x4x2x128xf32, #tpu.memory_space<vmem>>, vector<1x1x2x128xf32>,
    %86 = arith.mulf %62, %18 : vector<2x32x128xf32>
    %87 = arith.subf %58, %86 : vector<2x32x128xf32>
    %c2_i32 = arith.constant 2 : i32
    %88 = vector.broadcast %c2_i32 : i32 to vector<2x32x128xi32>
    %89 = arith.cmpi eq, %5, %88 : vector<2x32x128xi32>
    %90 = arith.extui %89 : vector<2x32x128xi1> to vector<2x32x128xi32>
    %91 = arith.sitofp %90 : vector<2x32x128xi32> to vector<2x32x128xf32>
    %92 = arith.mulf %23, %28 : vector<2x32x128xf32>
    %c0_60 = arith.constant 0 : index
    %c2 = arith.constant 2 : index
    %c0_61 = arith.constant 0 : index
    %c0_62 = arith.constant 0 : index
    %93 = vector.load %arg4[%c0_60, %c2, %c0_61, %c0_62] : memref<1x4x2x128xf32, #tpu.memory_space<vmem>>, vector<1x1x2x128xf32>
    %94 = vector.shape_cast %93 : vector<1x1x2x128xf32> to vector<2x128xf32>
    %95 = arith.mulf %91, %92 : vector<2x32x128xf32>
    %cst_63 = arith.constant dense<0.000000e+00> : vector<2x128xf32>
    %96 = vector.multi_reduction <add>, %95, %cst_63 [1] : vector<2x32x128xf32> to vector<2x128xf32>
    %97 = arith.addf %94, %96 : vector<2x128xf32>
    %c0_64 = arith.constant 0 : index
    %c2_65 = arith.constant 2 : index
    %c0_66 = arith.constant 0 : index
    %c0_67 = arith.constant 0 : index
    %98 = vector.load %arg4[%c0_64, %c2_65, %c0_66, %c0_67] : memref<1x4x2x128xf32, #tpu.memory_space<vmem>>, vector<1x1x2x128xf32>
    %99 = vector.shape_cast %98 : vector<1x1x2x128xf32> to vector<2x128xf32>
    %100 = vector.shape_cast %97 : vector<2x128xf32> to vector<1x1x2x128xf32>
    tpu.vector_store %arg4[%c0_64, %c2_65, %c0_66, %c0_67], %100 {strides = array<i32>} : memref<1x4x2x128xf32, #tpu.memory_space<vmem>>, vector<1x1x2x128xf32>,
    %c0_68 = arith.constant 0 : index
    %c2_69 = arith.constant 2 : index
    %c0_70 = arith.constant 0 : index
    %c0_71 = arith.constant 0 : index
    %101 = vector.load %arg5[%c0_68, %c2_69, %c0_70, %c0_71] : memref<1x4x2x128xf32, #tpu.memory_space<vmem>>, vector<1x1x2x128xf32>
    %102 = vector.shape_cast %101 : vector<1x1x2x128xf32> to vector<2x128xf32>
    %cst_72 = arith.constant dense<0.000000e+00> : vector<2x128xf32>
    %103 = vector.multi_reduction <add>, %92, %cst_72 [1] : vector<2x32x128xf32> to vector<2x128xf32>
    %104 = arith.addf %102, %103 : vector<2x128xf32>
    %c0_73 = arith.constant 0 : index
    %c2_74 = arith.constant 2 : index
    %c0_75 = arith.constant 0 : index
    %c0_76 = arith.constant 0 : index
    %105 = vector.load %arg5[%c0_73, %c2_74, %c0_75, %c0_76] : memref<1x4x2x128xf32, #tpu.memory_space<vmem>>, vector<1x1x2x128xf32>
    %106 = vector.shape_cast %105 : vector<1x1x2x128xf32> to vector<2x128xf32>
    %107 = vector.shape_cast %104 : vector<2x128xf32> to vector<1x1x2x128xf32>
    tpu.vector_store %arg5[%c0_73, %c2_74, %c0_75, %c0_76], %107 {strides = array<i32>} : memref<1x4x2x128xf32, #tpu.memory_space<vmem>>, vector<1x1x2x128xf32>,
    %c0_77 = arith.constant 0 : index
    %c2_78 = arith.constant 2 : index
    %c0_79 = arith.constant 0 : index
    %c0_80 = arith.constant 0 : index
    %108 = vector.load %arg6[%c0_77, %c2_78, %c0_79, %c0_80] : memref<1x4x2x128xf32, #tpu.memory_space<vmem>>, vector<1x1x2x128xf32>
    %109 = vector.shape_cast %108 : vector<1x1x2x128xf32> to vector<2x128xf32>
    %cst_81 = arith.constant dense<0.000000e+00> : vector<2x128xf32>
    %110 = vector.multi_reduction <add>, %91, %cst_81 [1] : vector<2x32x128xf32> to vector<2x128xf32>
    %111 = arith.addf %109, %110 : vector<2x128xf32>
    %c0_82 = arith.constant 0 : index
    %c2_83 = arith.constant 2 : index
    %c0_84 = arith.constant 0 : index
    %c0_85 = arith.constant 0 : index
    %112 = vector.load %arg6[%c0_82, %c2_83, %c0_84, %c0_85] : memref<1x4x2x128xf32, #tpu.memory_space<vmem>>, vector<1x1x2x128xf32>
    %113 = vector.shape_cast %112 : vector<1x1x2x128xf32> to vector<2x128xf32>
    %114 = vector.shape_cast %111 : vector<2x128xf32> to vector<1x1x2x128xf32>
    tpu.vector_store %arg6[%c0_82, %c2_83, %c0_84, %c0_85], %114 {strides = array<i32>} : memref<1x4x2x128xf32, #tpu.memory_space<vmem>>, vector<1x1x2x128xf32>,
    %115 = arith.mulf %91, %19 : vector<2x32x128xf32>
    %116 = arith.subf %87, %115 : vector<2x32x128xf32>
    %c3_i32 = arith.constant 3 : i32
    %117 = vector.broadcast %c3_i32 : i32 to vector<2x32x128xi32>
    %118 = arith.cmpi eq, %5, %117 : vector<2x32x128xi32>
    %119 = arith.extui %118 : vector<2x32x128xi1> to vector<2x32x128xi32>
    %120 = arith.sitofp %119 : vector<2x32x128xi32> to vector<2x32x128xf32>
    %121 = arith.mulf %24, %28 : vector<2x32x128xf32>
    %c0_86 = arith.constant 0 : index
    %c3 = arith.constant 3 : index
    %c0_87 = arith.constant 0 : index
    %c0_88 = arith.constant 0 : index
    %122 = vector.load %arg4[%c0_86, %c3, %c0_87, %c0_88] : memref<1x4x2x128xf32, #tpu.memory_space<vmem>>, vector<1x1x2x128xf32>
    %123 = vector.shape_cast %122 : vector<1x1x2x128xf32> to vector<2x128xf32>
    %124 = arith.mulf %120, %121 : vector<2x32x128xf32>
    %cst_89 = arith.constant dense<0.000000e+00> : vector<2x128xf32>
    %125 = vector.multi_reduction <add>, %124, %cst_89 [1] : vector<2x32x128xf32> to vector<2x128xf32>
    %126 = arith.addf %123, %125 : vector<2x128xf32>
    %c0_90 = arith.constant 0 : index
    %c3_91 = arith.constant 3 : index
    %c0_92 = arith.constant 0 : index
    %c0_93 = arith.constant 0 : index
    %127 = vector.load %arg4[%c0_90, %c3_91, %c0_92, %c0_93] : memref<1x4x2x128xf32, #tpu.memory_space<vmem>>, vector<1x1x2x128xf32>
    %128 = vector.shape_cast %127 : vector<1x1x2x128xf32> to vector<2x128xf32>
    %129 = vector.shape_cast %126 : vector<2x128xf32> to vector<1x1x2x128xf32>
    tpu.vector_store %arg4[%c0_90, %c3_91, %c0_92, %c0_93], %129 {strides = array<i32>} : memref<1x4x2x128xf32, #tpu.memory_space<vmem>>, vector<1x1x2x128xf32>,
    %c0_94 = arith.constant 0 : index
    %c3_95 = arith.constant 3 : index
    %c0_96 = arith.constant 0 : index
    %c0_97 = arith.constant 0 : index
    %130 = vector.load %arg5[%c0_94, %c3_95, %c0_96, %c0_97] : memref<1x4x2x128xf32, #tpu.memory_space<vmem>>, vector<1x1x2x128xf32>
    %131 = vector.shape_cast %130 : vector<1x1x2x128xf32> to vector<2x128xf32>
    %cst_98 = arith.constant dense<0.000000e+00> : vector<2x128xf32>
    %132 = vector.multi_reduction <add>, %121, %cst_98 [1] : vector<2x32x128xf32> to vector<2x128xf32>
    %133 = arith.addf %131, %132 : vector<2x128xf32>
    %c0_99 = arith.constant 0 : index
    %c3_100 = arith.constant 3 : index
    %c0_101 = arith.constant 0 : index
    %c0_102 = arith.constant 0 : index
    %134 = vector.load %arg5[%c0_99, %c3_100, %c0_101, %c0_102] : memref<1x4x2x128xf32, #tpu.memory_space<vmem>>, vector<1x1x2x128xf32>
    %135 = vector.shape_cast %134 : vector<1x1x2x128xf32> to vector<2x128xf32>
    %136 = vector.shape_cast %133 : vector<2x128xf32> to vector<1x1x2x128xf32>
    tpu.vector_store %arg5[%c0_99, %c3_100, %c0_101, %c0_102], %136 {strides = array<i32>} : memref<1x4x2x128xf32, #tpu.memory_space<vmem>>, vector<1x1x2x128xf32>,
    %c0_103 = arith.constant 0 : index
    %c3_104 = arith.constant 3 : index
    %c0_105 = arith.constant 0 : index
    %c0_106 = arith.constant 0 : index
    %137 = vector.load %arg6[%c0_103, %c3_104, %c0_105, %c0_106] : memref<1x4x2x128xf32, #tpu.memory_space<vmem>>, vector<1x1x2x128xf32>
    %138 = vector.shape_cast %137 : vector<1x1x2x128xf32> to vector<2x128xf32>
    %cst_107 = arith.constant dense<0.000000e+00> : vector<2x128xf32>
    %139 = vector.multi_reduction <add>, %120, %cst_107 [1] : vector<2x32x128xf32> to vector<2x128xf32>
    %140 = arith.addf %138, %139 : vector<2x128xf32>
    %c0_108 = arith.constant 0 : index
    %c3_109 = arith.constant 3 : index
    %c0_110 = arith.constant 0 : index
    %c0_111 = arith.constant 0 : index
    %141 = vector.load %arg6[%c0_108, %c3_109, %c0_110, %c0_111] : memref<1x4x2x128xf32, #tpu.memory_space<vmem>>, vector<1x1x2x128xf32>
    %142 = vector.shape_cast %141 : vector<1x1x2x128xf32> to vector<2x128xf32>
    %143 = vector.shape_cast %140 : vector<2x128xf32> to vector<1x1x2x128xf32>
    tpu.vector_store %arg6[%c0_108, %c3_109, %c0_110, %c0_111], %143 {strides = array<i32>} : memref<1x4x2x128xf32, #tpu.memory_space<vmem>>, vector<1x1x2x128xf32>,
    %144 = arith.mulf %120, %20 : vector<2x32x128xf32>
    %145 = arith.subf %116, %144 : vector<2x32x128xf32>
    %c0_112 = arith.constant 0 : index
    %c0_113 = arith.constant 0 : index
    %c0_114 = arith.constant 0 : index
    %146 = vector.load %arg7[%c0_112, %c0_113, %c0_114] : memref<1x2x128xf32, #tpu.memory_space<vmem>>, vector<1x2x128xf32>
    %147 = vector.shape_cast %146 : vector<1x2x128xf32> to vector<2x128xf32>
    %cst_115 = arith.constant dense<0.000000e+00> : vector<2x128xf32>
    %148 = vector.multi_reduction <add>, %145, %cst_115 [1] : vector<2x32x128xf32> to vector<2x128xf32>
    %149 = arith.addf %147, %148 : vector<2x128xf32>
    %c0_116 = arith.constant 0 : index
    %c0_117 = arith.constant 0 : index
    %c0_118 = arith.constant 0 : index
    %150 = vector.load %arg7[%c0_116, %c0_117, %c0_118] : memref<1x2x128xf32, #tpu.memory_space<vmem>>, vector<1x2x128xf32>
    %151 = vector.shape_cast %150 : vector<1x2x128xf32> to vector<2x128xf32>
    %152 = vector.shape_cast %149 : vector<2x128xf32> to vector<1x2x128xf32>
    tpu.vector_store %arg7[%c0_116, %c0_117, %c0_118], %152 {strides = array<i32>} : memref<1x2x128xf32, #tpu.memory_space<vmem>>, vector<1x2x128xf32>,
    return
  }
  func.func @transform_0(%arg0: i32, %arg1: i32) -> (i32, i32, i32, i32) {
    %c1_i32 = arith.constant 1 : i32
    %0 = arith.muli %arg0, %c1_i32 : i32
    %1 = arith.addi %0, %arg1 : i32
    %c0_i32 = arith.constant 0 : i32
    %c0_i32_0 = arith.constant 0 : i32
    %c0_i32_1 = arith.constant 0 : i32
    %c0_i32_2 = arith.constant 0 : i32
    return %c0_i32, %c0_i32_0, %1, %c0_i32_1 : i32, i32, i32, i32
  }
  func.func @transform_1(%arg0: i32, %arg1: i32) -> (i32, i32, i32) {
    %c1_i32 = arith.constant 1 : i32
    %0 = arith.muli %arg0, %c1_i32 : i32
    %1 = arith.addi %0, %arg1 : i32
    %c0_i32 = arith.constant 0 : i32
    %c0_i32_0 = arith.constant 0 : i32
    %c0_i32_1 = arith.constant 0 : i32
    return %c0_i32, %1, %c0_i32_0 : i32, i32, i32
  }
  func.func @transform_2(%arg0: i32, %arg1: i32) -> (i32, i32, i32, i32) {
    %c0_i32 = arith.constant 0 : i32
    %c0_i32_0 = arith.constant 0 : i32
    %c0_i32_1 = arith.constant 0 : i32
    %c0_i32_2 = arith.constant 0 : i32
    return %arg0, %c0_i32, %c0_i32_0, %c0_i32_1 : i32, i32, i32, i32
  }
  func.func @transform_3(%arg0: i32, %arg1: i32) -> (i32, i32, i32, i32) {
    %c0_i32 = arith.constant 0 : i32
    %c0_i32_0 = arith.constant 0 : i32
    %c0_i32_1 = arith.constant 0 : i32
    %c0_i32_2 = arith.constant 0 : i32
    return %arg0, %c0_i32, %c0_i32_0, %c0_i32_1 : i32, i32, i32, i32
  }
  func.func @transform_4(%arg0: i32, %arg1: i32) -> (i32, i32, i32, i32) {
    %c0_i32 = arith.constant 0 : i32
    %c0_i32_0 = arith.constant 0 : i32
    %c0_i32_1 = arith.constant 0 : i32
    %c0_i32_2 = arith.constant 0 : i32
    return %arg0, %c0_i32, %c0_i32_0, %c0_i32_1 : i32, i32, i32, i32
  }
  func.func @transform_5(%arg0: i32, %arg1: i32) -> (i32, i32, i32) {
    %c0_i32 = arith.constant 0 : i32
    %c0_i32_0 = arith.constant 0 : i32
    %c0_i32_1 = arith.constant 0 : i32
    return %arg0, %c0_i32, %c0_i32_0 : i32, i32, i32
  }
}

</mosaic_0001>

<bundles_post_ra>
// kernel: region_tversky_ce_loss.1
= control target key start
LH: loop header
LB: loop body
LE: loop exit
PB: predicated region body
PF: predicated region fallthrough
CT: control target
= control target key end

     0   :  { %v2085_v0 = vmov 0.0   ;;  %vm342_vm14 = vcmask 1041409   ;;  %s2069_s2 = inlined_call_operand.vmem [shape: f32[1,4,2,128], index: 2, kind: output, shape index: {0}]   ;;  %s2070_s3 = inlined_call_operand.vmem [shape: f32[1,4,2,128], index: 3, kind: output, shape index: {1}]   ;;  %s2071_s4 = inlined_call_operand.vmem [shape: f32[1,4,2,128], index: 4, kind: output, shape index: {2}]   ;;  %s2072_s5 = inlined_call_operand.vmem [shape: f32[1,2,128], index: 5, kind: output, shape index: {3}]   ;;  %s2073_s0 = inlined_call_operand.vmem [shape: f32[2,4,32,128], index: 0, kind: input, shape index: {}]   ;;  %s2074_s1 = inlined_call_operand.vmem [shape: s8[2,32,128], index: 1, kind: input, shape index: {}]  }
   0x1   :  { %58 = vst [vmem:[%s2069_s2] sm:$0x3] %v2085_v0  ;;  %59 = vst [vmem:[%s2069_s2 + $0x2] sm:$0x3] %v2085_v0  ;;  %v71_v1 = vld [vmem:[%s2073_s0] sm:$0xff]  ;;  %v72_v2 = vld [vmem:[%s2073_s0 + $0x8] sm:$0xff] }
   0x2   :  { %60 = vst [vmem:[%s2069_s2 + $0x4] sm:$0x3] %v2085_v0  ;;  %61 = vst [vmem:[%s2069_s2 + $0x6] sm:$0x3] %v2085_v0  ;;  %v73_v3 = vld [vmem:[%s2073_s0 + $0x10] sm:$0xff]  ;;  %v74_v4 = vld [vmem:[%s2073_s0 + $0x18] sm:$0xff] }
   0x3   :  { %62 = vst [vmem:[%s2070_s3] sm:$0x3] %v2085_v0  ;;  %63 = vst [vmem:[%s2070_s3 + $0x2] sm:$0x3] %v2085_v0  ;;  %v75_v5 = vld [vmem:[%s2073_s0 + $0x20] sm:$0xff]  ;;  %v1116_v6 = vld [vmem:[%s2073_s0 + $0x28] sm:$0xff] }
   0x4   :  { %64 = vst [vmem:[%s2070_s3 + $0x4] sm:$0x3] %v2085_v0  ;;  %65 = vst [vmem:[%s2070_s3 + $0x6] sm:$0x3] %v2085_v0  ;;  %v1121_v7 = vld [vmem:[%s2073_s0 + $0x30] sm:$0xff]  ;;  %v1126_v8 = vld [vmem:[%s2073_s0 + $0x38] sm:$0xff]  ;;  %v113_v10 = vmax.f32 %v71_v1, %v75_v5  ;;  %v114_v11 = vmax.f32 %v72_v2, %v1116_v6 }
   0x5   :  { %66 = vst [vmem:[%s2071_s4] sm:$0x3] %v2085_v0  ;;  %67 = vst [vmem:[%s2071_s4 + $0x2] sm:$0x3] %v2085_v0  ;;  %v1131_v9 = vld [vmem:[%s2073_s0 + $0x40] sm:$0xff]  ;;  %v1137_v12 = vld [vmem:[%s2073_s0 + $0x48] sm:$0xff]  ;;  %v115_v15 = vmax.f32 %v73_v3, %v1121_v7  ;;  %v116_v16 = vmax.f32 %v74_v4, %v1126_v8 }
   0x6   :  { %68 = vst [vmem:[%s2071_s4 + $0x4] sm:$0x3] %v2085_v0  ;;  %69 = vst [vmem:[%s2071_s4 + $0x6] sm:$0x3] %v2085_v0  ;;  %v1142_v13 = vld [vmem:[%s2073_s0 + $0x50] sm:$0xff]  ;;  %v1147_v14 = vld [vmem:[%s2073_s0 + $0x58] sm:$0xff]  ;;  %v121_v20 = vmax.f32 %v113_v10, %v1131_v9  ;;  %v122_v21 = vmax.f32 %v114_v11, %v1137_v12 }
   0x7   :  { %70 = vst [vmem:[%s2072_s5] sm:$0x3] %v2085_v0  ;;  %v1154_v17 = vld [vmem:[%s2073_s0 + $0x60] sm:$0xff]  ;;  %v1159_v18 = vld [vmem:[%s2073_s0 + $0x68] sm:$0xff]  ;;  %v1164_v19 = vld [vmem:[%s2073_s0 + $0x70] sm:$0xff]  ;;  %v123_v25 = vmax.f32 %v115_v15, %v1142_v13  ;;  %v124_v26 = vmax.f32 %v116_v16, %v1147_v14 }
   0x8   :  { %v1171_v22 = vld [vmem:[%s2073_s0 + $0x78] sm:$0xff]  ;;  %v87_v23 = vld [vmem:[%s2073_s0 + $0x80] sm:$0xff]  ;;  %v88_v24 = vld [vmem:[%s2073_s0 + $0x88] sm:$0xff]  ;;  %v129_v30 = vmax.f32 %v121_v20, %v1154_v17  ;;  %v130_v31 = vmax.f32 %v122_v21, %v1159_v18 }
   0x9   :  { %v89_v27 = vld [vmem:[%s2073_s0 + $0x90] sm:$0xff]  ;;  %v90_v28 = vld [vmem:[%s2073_s0 + $0x98] sm:$0xff]  ;;  %v91_v29 = vld [vmem:[%s2073_s0 + $0xa0] sm:$0xff]  ;;  %v131_v36 = vmax.f32 %v123_v25, %v1164_v19  ;;  %v132_v37 = vmax.f32 %v124_v26, %v1171_v22 }
   0xa   :  { %v92_v32 = vld [vmem:[%s2073_s0 + $0xa8] sm:$0xff]  ;;  %v93_v33 = vld [vmem:[%s2073_s0 + $0xb0] sm:$0xff]  ;;  %v94_v34 = vld [vmem:[%s2073_s0 + $0xb8] sm:$0xff]  ;;  %v117_v35 = vmax.f32 %v87_v23, %v91_v29  ;;  %v1221_v48 = vsub.f32 %v71_v1, %v129_v30  ;;  %v1232_v55 = vsub.f32 %v72_v2, %v130_v31  ;;  %v1243_v60 = vsub.f32 %v75_v5, %v129_v30 }
   0xb   :  { %v95_v38 = vld [vmem:[%s2073_s0 + $0xc0] sm:$0xff]  ;;  %v96_v39 = vld [vmem:[%s2073_s0 + $0xc8] sm:$0xff]  ;;  %v97_v40 = vld [vmem:[%s2073_s0 + $0xd0] sm:$0xff]  ;;  %v118_v41 = vmax.f32 %v88_v24, %v92_v32  ;;  %v119_v42 = vmax.f32 %v89_v27, %v93_v33  ;;  %v120_v43 = vmax.f32 %v90_v28, %v94_v34  ;;  %v1239_v58 = vsub.f32 %v73_v3, %v131_v36 }
   0xc   :  { %v98_v44 = vld [vmem:[%s2073_s0 + $0xd8] sm:$0xff]  ;;  %v99_v45 = vld [vmem:[%s2073_s0 + $0xe0] sm:$0xff]  ;;  %v100_v46 = vld [vmem:[%s2073_s0 + $0xe8] sm:$0xff]  ;;  %v125_v47 = vmax.f32 %v117_v35, %v95_v38  ;;  %v1241_v59 = vsub.f32 %v74_v4, %v132_v37  ;;  %v1260_v5 = vsub.f32 %v1116_v6, %v130_v31  ;;  %v1265_v21 = vsub.f32 %v1121_v7, %v131_v36 }
   0xd   :  { %v101_v49 = vld [vmem:[%s2073_s0 + $0xf0] sm:$0xff]  ;;  %v102_v50 = vld [vmem:[%s2073_s0 + $0xf8] sm:$0xff]  ;;  %v103_v51 = vld [vmem:[%s2074_s1] sm:$0xff]  ;;  %v126_v52 = vmax.f32 %v118_v41, %v96_v39  ;;  %v127_v53 = vmax.f32 %v119_v42, %v97_v40  ;;  %v128_v54 = vmax.f32 %v120_v43, %v98_v44  ;;  %v1268_v25 = vsub.f32 %v1126_v8, %v132_v37 }
   0xe   :  { %v104_v56 = vld [vmem:[%s2074_s1 + $0x8] sm:$0xff]  ;;  %v1237_v57 = vunpack.c.0.s8 %v103_v51  ;;  %v1245_v61 = vunpack.c.1.s8 %v103_v51  ;;  %v1247_v62 = vunpack.c.2.s8 %v103_v51  ;;  %v1249_v63 = vunpack.c.3.s8 %v103_v51 }
   0xf   :  { %v1251_v1 = vunpack.c.0.s8 %v104_v56  ;;  %v133_v2 = vmax.f32 %v125_v47, %v99_v45  ;;  %v134_v10 = vmax.f32 %v126_v52, %v100_v46  ;;  %v135_v11 = vmax.f32 %v127_v53, %v101_v49 }
  0x10   :  { %2140 = vst [vmem:[#allocation2_spill] sm:$0xff] %v1245_v61  ;;  %2141 = vst [vmem:[#allocation3_spill] sm:$0xff] %v1247_v62  ;;  %v136_v15 = vmax.f32 %v128_v54, %v102_v50  ;;  %v1253_v16 = vunpack.c.1.s8 %v104_v56  ;;  %v1255_v3 = vunpack.c.2.s8 %v104_v56  ;;  %v1257_v4 = vunpack.c.3.s8 %v104_v56 }
  0x11   :  { %2142 = vst [vmem:[#allocation4_spill] sm:$0xff] %v1249_v63  ;;  %2143 = vst [vmem:[#allocation5_spill] sm:$0xff] %v1251_v1  ;;  %v1262_v20 = vsub.f32 %v87_v23, %v133_v2  ;;  %v1271_v26 = vsub.f32 %v1131_v9, %v129_v30  ;;  %v1273_v35 = vsub.f32 %v88_v24, %v134_v10  ;;  %v191_v47 = vmul.f32 1.442695, %v1268_v25 }
  0x12   :  { %2144 = vst [vmem:[#allocation6_spill] sm:$0xff] %v1253_v16  ;;  %2145 = vst [vmem:[#allocation7_spill] sm:$0xff] %v1255_v3  ;;  %v1275_v41 = vsub.f32 %v89_v27, %v135_v11  ;;  %v1277_v42 = vsub.f32 %v90_v28, %v136_v15  ;;  %v1279_v43 = vsub.f32 %v91_v29, %v133_v2  ;;  %vm281_vm0 = vcmp.eq.s32.totalorder %v1237_v57, 0 }
  0x13   :  { %2146 = vst [vmem:[#allocation8_spill] sm:$0xff] %v1257_v4  ;;  %2147 = vst [vmem:[#allocation9_spill] sm:$0xff] %v1271_v26  ;;  %v1281_v6 = vsub.f32 %v92_v32, %v134_v10  ;;  %v1283_v23 = vsub.f32 %v93_v33, %v135_v11  ;;  %v1285_v7 = vsub.f32 %v94_v34, %v136_v15  ;;  %v201_v53 = vmul.f32 1.442695, %v1271_v26 }
  0x14   :  { %v1288_v8 = vsub.f32 %v1137_v12, %v130_v31  ;;  %v1291_v9 = vsub.f32 %v1142_v13, %v131_v36  ;;  %v1294_v24 = vsub.f32 %v1147_v14, %v132_v37  ;;  %v1296_v27 = vsub.f32 %v95_v38, %v133_v2 }
  0x15   :  { %v1298_v28 = vsub.f32 %v96_v39, %v134_v10  ;;  %v1300_v29 = vsub.f32 %v97_v40, %v135_v11  ;;  %v1302_v32 = vsub.f32 %v98_v44, %v136_v15  ;;  %v1305_v33 = vsub.f32 %v1154_v17, %v129_v30 }
  0x16   :  { %2148 = vst [vmem:[#allocation10_spill] sm:$0xff] %v1288_v8  ;;  %2149 = vst [vmem:[#allocation11_spill] sm:$0xff] %v1291_v9  ;;  %v1308_v12 = vsub.f32 %v1159_v18, %v130_v31  ;;  %v1311_v13 = vsub.f32 %v1164_v19, %v131_v36  ;;  %v1314_v14 = vsub.f32 %v1171_v22, %v132_v37  ;;  %v169_v38 = vmul.f32 1.442695, %v1221_v48 }
  0x17   :  { %2150 = vst [vmem:[#allocation12_spill] sm:$0xff] %v1294_v24  ;;  %2151 = vst [vmem:[#allocation13_spill] sm:$0xff] %v1296_v27  ;;  %v1316_v34 = vsub.f32 %v99_v45, %v133_v2  ;;  %v1319_v39 = vsub.f32 %v100_v46, %v134_v10  ;;  %v171_v40 = vmul.f32 1.442695, %v1232_v55  ;;  %v173_v17 = vmul.f32 1.442695, %v1239_v58 }
  0x18   :  { %2152 = vst [vmem:[#allocation14_spill] sm:$0xff] %v1298_v28  ;;  %2153 = vst [vmem:[#allocation15_spill] sm:$0xff] %v1300_v29  ;;  %v175_v30 = vmul.f32 1.442695, %v1241_v59  ;;  %v1324_v18 = vsub.f32 %v101_v49, %v135_v11  ;;  %v1326_v31 = vsub.f32 %v102_v50, %v136_v15  ;;  %919 = vpow2.f32 %v169_v38 }
  0x19   :  { %2154 = vst [vmem:[#allocation16_spill] sm:$0xff] %v1302_v32  ;;  %2155 = vst [vmem:[#allocation17_spill] sm:$0xff] %v1305_v33  ;;  %v177_v19 = vmul.f32 1.442695, %v1262_v20  ;;  %921 = vpow2.f32 %v171_v40  ;;  %v179_v22 = vmul.f32 1.442695, %v1273_v35 }
  0x1a   :  { %2156 = vst [vmem:[#allocation18_spill] sm:$0xff] %v1308_v12  ;;  %2157 = vst [vmem:[#allocation19_spill] sm:$0xff] %v1311_v13  ;;  %v181_v36 = vmul.f32 1.442695, %v1275_v41  ;;  %v183_v37 = vmul.f32 1.442695, %v1277_v42  ;;  %923 = vpow2.f32 %v173_v17 }
  0x1b   :  { %2158 = vst [vmem:[#allocation20_spill] sm:$0xff] %v1314_v14  ;;  %2159 = vst [vmem:[#allocation21_spill] sm:$0xff] %v1316_v34  ;;  %v185_v44 = vmul.f32 1.442695, %v1243_v60  ;;  %v187_v45 = vmul.f32 1.442695, %v1260_v5  ;;  %925 = vpow2.f32 %v175_v30 }
  0x1c   :  { %2160 = vst [vmem:[#allocation22_spill] sm:$0xff] %v1319_v39  ;;  %2161 = vst [vmem:[#allocation23_spill] sm:$0xff] %v1324_v18  ;;  %v189_v46 = vmul.f32 1.442695, %v1265_v21  ;;  %v193_v49 = vmul.f32 1.442695, %v1279_v43  ;;  %927 = vpow2.f32 %v177_v19 }
  0x1d   :  { %2162 = vst [vmem:[#allocation24_spill] sm:$0xff] %v1326_v31  ;;  %v195_v50 = vmul.f32 1.442695, %v1281_v6  ;;  %v197_v51 = vmul.f32 1.442695, %v1283_v23  ;;  %929 = vpow2.f32 %v179_v22  ;;  %vm282_vm1 = vcmp.eq.s32.totalorder %v1245_v61, 0 }
  0x1e   :  { %v199_v52 = vmul.f32 1.442695, %v1285_v7  ;;  %v203_v54 = vmul.f32 1.442695, %v1288_v8  ;;  %v205_v56 = vmul.f32 1.442695, %v1291_v9  ;;  %931 = vpow2.f32 %v181_v36 }
  0x1f   :  { %v207_v2 = vmul.f32 1.442695, %v1294_v24  ;;  %v1345_v10 = vmul.f32 1.442695, %v1296_v27  ;;  %v1348_v11 = vmul.f32 1.442695, %v1298_v28  ;;  %933 = vpow2.f32 %v183_v37 }
  0x20   :  { %v1351_v15 = vmul.f32 1.442695, %v1300_v29  ;;  %v1354_v38 = vmul.f32 1.442695, %v1302_v32  ;;  %v1357_v40 = vmul.f32 1.442695, %v1305_v33  ;;  %935 = vpow2.f32 %v185_v44 }
  0x21   :  { %v1360_v17 = vmul.f32 1.442695, %v1308_v12  ;;  %v1363_v30 = vmul.f32 1.442695, %v1311_v13  ;;  %v1366_v19 = vmul.f32 1.442695, %v1314_v14  ;;  %937 = vpow2.f32 %v187_v45 }
  0x22   :  { %v1369_v22 = vmul.f32 1.442695, %v1316_v34  ;;  %v1372_v36 = vmul.f32 1.442695, %v1319_v39  ;;  %v1376_v37 = vpop.eup %919  ;;  %939 = vpow2.f32 %v189_v46  ;;  %vm283_vm2 = vcmp.eq.s32.totalorder %v1247_v62, 0 }
  0x23   :  { %vm284_vm3 = vcmp.eq.s32.totalorder %v1249_v63, 0  ;;  %vm285_vm4 = vcmp.eq.s32.totalorder %v1251_v1, 0  ;;  %v1381_v44 = vpop.eup %921  ;;  %941 = vpow2.f32 %v191_v47  ;;  %vm286_vm5 = vcmp.eq.s32.totalorder %v1253_v16, 0 }
  0x24   :  { %vm287_vm6 = vcmp.eq.s32.totalorder %v1255_v3, 0  ;;  %vm288_vm7 = vcmp.eq.s32.totalorder %v1257_v4, 0  ;;  %v1386_v45 = vpop.eup %923  ;;  %943 = vpow2.f32 %v193_v49  ;;  %v1389_v46 = vsel %vm281_vm0, 1.0, %v2085_v0 }
  0x25   :  { %v1392_v32 = vsel %vm282_vm1, 1.0, %v2085_v0  ;;  %v1395_v39 = vsel %vm283_vm2, 1.0, %v2085_v0  ;;  %v1397_v34 = vpop.eup %925  ;;  %945 = vpow2.f32 %v195_v50  ;;  %v1400_v47 = vsel %vm284_vm3, 1.0, %v2085_v0 }
  0x26   :  { %2163 = vst [vmem:[#allocation25_spill] sm:$0xff] %v1400_v47  ;;  %v1403_v14 = vsel %vm285_vm4, 1.0, %v2085_v0  ;;  %v1406_v49 = vsel %vm286_vm5, 1.0, %v2085_v0  ;;  %v1408_v13 = vpop.eup %927  ;;  %947 = vpow2.f32 %v197_v51  ;;  %v1411_v12 = vsel %vm287_vm6, 1.0, %v2085_v0 }
  0x27   :  { %2164 = vst [vmem:[#allocation26_spill] sm:$0xff] %v1403_v14  ;;  %2165 = vst [vmem:[#allocation27_spill] sm:$0xff] %v1406_v49  ;;  %v1414_v33 = vsel %vm288_vm7, 1.0, %v2085_v0  ;;  %v1418_v50 = vmul.f32 %v1389_v46, %v1221_v48  ;;  %v1420_v29 = vpop.eup %929  ;;  %949 = vpow2.f32 %v199_v52  ;;  %v1424_v28 = vmul.f32 %v1392_v32, %v1232_v55 }
  0x28   :  { %2166 = vst [vmem:[#allocation28_spill] sm:$0xff] %v1411_v12  ;;  %2167 = vst [vmem:[#allocation29_spill] sm:$0xff] %v1414_v33  ;;  %v1428_v51 = vmul.f32 %v1395_v39, %v1239_v58  ;;  %v1432_v27 = vmul.f32 %v1400_v47, %v1241_v59  ;;  %v1434_v0 = vpop.eup %931  ;;  %951 = vpow2.f32 %v201_v53  ;;  %v1438_v48 = vmul.f32 %v1403_v14, %v1262_v20 }
  0x29   :  { %2168 = vst [vmem:[#allocation30_spill] sm:$0xff] %v1418_v50  ;;  %2169 = vst [vmem:[#allocation31_spill] sm:$0xff] %v1424_v28  ;;  %v1442_v52 = vmul.f32 %v1406_v49, %v1273_v35  ;;  %v1446_v55 = vmul.f32 %v1411_v12, %v1275_v41  ;;  %v1448_v58 = vpop.eup %933  ;;  %953 = vpow2.f32 %v203_v54  ;;  %v1452_v59 = vmul.f32 %v1414_v33, %v1277_v42 }
  0x2a   :  { %2170 = vst [vmem:[#allocation32_spill] sm:$0xff] %v1428_v51  ;;  %2171 = vst [vmem:[#allocation33_spill] sm:$0xff] %v1432_v27  ;;  %v373_v53 = vadd.f32 %v1392_v32, %v1389_v46  ;;  %v382_v20 = vadd.f32 %v1406_v49, %v1403_v14  ;;  %955 = vpow2.f32 %v205_v56  ;;  %v229_v35 = vmul.f32 1.442695, %v1324_v18 }
  0x2b   :  { %2172 = vst [vmem:[#allocation34_spill] sm:$0xff] %v1434_v0  ;;  %2173 = vst [vmem:[#allocation35_spill] sm:$0xff] %v1438_v48  ;;  %v1458_v48 = vpop.eup %935  ;;  %v1462_v41 = vmul.f32 1.442695, %v1326_v31  ;;  %vm413_vm8 = vcmp.eq.s32.totalorder %v1237_v57, 1  ;;  %957 = vpow2.f32 %v207_v2  ;;  %vm414_vm9 = vcmp.eq.s32.totalorder %v1245_v61, 1 }
  0x2c   :  { %2174 = vst [vmem:[#allocation36_spill] sm:$0xff] %v1442_v52  ;;  %2175 = vst [vmem:[#allocation37_spill] sm:$0xff] %v1446_v55  ;;  %v1465_v54 = vpop.eup %937  ;;  %v374_v42 = vadd.f32 %v1395_v39, %v373_v53  ;;  %959 = vpow2.f32 %v1345_v10  ;;  %v233_v56 = vadd.f32 %v1458_v48, %v1376_v37  ;;  %vm415_vm10 = vcmp.eq.s32.totalorder %v1247_v62, 1 }
  0x2d   :  { %2176 = vst [vmem:[#allocation38_spill] sm:$0xff] %v1448_v58  ;;  %2177 = vst [vmem:[#allocation39_spill] sm:$0xff] %v1452_v59  ;;  %v383_v59 = vadd.f32 %v1411_v12, %v382_v20  ;;  %v1470_v55 = vpop.eup %939  ;;  %v234_v31 = vadd.f32 %v1465_v54, %v1381_v44  ;;  %961 = vpow2.f32 %v1348_v11  ;;  %vm416_vm11 = vcmp.eq.s32.totalorder %v1249_v63, 1 }
  0x2e   :  { %v1478_v18 = vpop.eup %941  ;;  %v375_v2 = vadd.f32 %v1400_v47, %v374_v42  ;;  %963 = vpow2.f32 %v1351_v15  ;;  %v235_v10 = vadd.f32 %v1470_v55, %v1386_v45  ;;  %vm417_vm12 = vcmp.eq.s32.totalorder %v1251_v1, 1 }
  0x2f   :  { %v384_v53 = vadd.f32 %v1414_v33, %v383_v59  ;;  %v1484_v20 = vpop.eup %943  ;;  %v236_v52 = vadd.f32 %v1478_v18, %v1397_v34  ;;  %965 = vpow2.f32 %v1354_v38  ;;  %vm418_vm13 = vcmp.eq.s32.totalorder %v1253_v16, 1 }
  0x30   :  { %v1492_v27 = vpop.eup %945  ;;  %v376_v11 = vrot.slane %v375_v2, 4  ;;  %967 = vpow2.f32 %v1357_v40  ;;  %v237_v15 = vadd.f32 %v1484_v20, %v1408_v13  ;;  %vm419_vm15 = vcmp.eq.s32.totalorder %v1255_v3, 1 }
  0x31   :  { %2178 = vst [vmem:[#allocation40_spill] sm:$0xff] %v1492_v27  ;;  %v385_v59 = vrot.slane %v384_v53, 4  ;;  %v1496_v42 = vpop.eup %947  ;;  %v238_v51 = vadd.f32 %v1492_v27, %v1420_v29  ;;  %969 = vpow2.f32 %v1360_v17  ;;  %vm420_vm0 = vcmp.eq.s32.totalorder %v1257_v4, 1  ;;  %v372_v27 = vld [vmem:[%s2071_s4] sm:$0x3] }
  0x32   :  { %2179 = vst [vmem:[#allocation41_spill] sm:$0xff] %v1496_v42  ;;  %v1504_v28 = vpop.eup %949  ;;  %v377_v38 = vadd.f32 %v376_v11, %v375_v2  ;;  %971 = vpow2.f32 %v1363_v30  ;;  %v239_v40 = vadd.f32 %v1496_v42, %v1434_v0  ;;  %v2181_v8 = vmov 0.0  }
  0x33   :  { %2180 = vst [vmem:[#allocation42_spill] sm:$0xff] %v1504_v28  ;;  %v386_v50 = vadd.f32 %v385_v59, %v384_v53  ;;  %v1508_v24 = vpop.eup %951  ;;  %v240_v9 = vadd.f32 %v1504_v28, %v1448_v58  ;;  %v1518_v26 = vsel %vm413_vm8, 1.0, %v2181_v8  ;;  %973 = vpow2.f32 %v1366_v19 }
  0x34   :  { %v1520_v17 = vpop.eup %953  ;;  %v378_v2 = vrot.slane %v377_v38, 2  ;;  %v1526_v30 = vsel %vm414_vm9, 1.0, %v2181_v8  ;;  %975 = vpow2.f32 %v1369_v22  ;;  %v241_v59 = vadd.f32 %v1508_v24, %v233_v56 }
  0x35   :  { %v387_v53 = vrot.slane %v386_v50, 2  ;;  %v1528_v11 = vpop.eup %955  ;;  %v242_v33 = vadd.f32 %v1520_v17, %v234_v31  ;;  %v1536_v28 = vsel %vm415_vm10, 1.0, %v2181_v8  ;;  %977 = vpow2.f32 %v1372_v36 }
  0x36   :  { %2182 = vst [vmem:[#allocation43_spill] sm:$0xff] %v1528_v11  ;;  %v1538_v19 = vpop.eup %957  ;;  %v379_v12 = vadd.f32 %v378_v2, %v377_v38  ;;  %v1544_v58 = vsel %vm416_vm11, 1.0, %v2181_v8  ;;  %979 = vpow2.f32 %v229_v35  ;;  %v243_v31 = vadd.f32 %v1528_v11, %v235_v10 }
  0x37   :  { %2183 = vst [vmem:[#allocation44_spill] sm:$0xff] %v1538_v19  ;;  %v388_v49 = vadd.f32 %v387_v53, %v386_v50  ;;  %v1546_v22 = vpop.eup %959  ;;  %v244_v56 = vadd.f32 %v1538_v19, %v236_v52  ;;  %v1553_v42 = vsel %vm417_vm12, 1.0, %v2181_v8  ;;  %981 = vpow2.f32 %v1462_v41 }
  0x38   :  { %v1555_v36 = vpop.eup %961  ;;  %v380_v50 = vrot.slane %v379_v12, 1  ;;  %v1561_v2 = vsel %vm418_vm13, 1.0, %v2181_v8  ;;  %v1568_v52 = vsel %vm419_vm15, 1.0, %v2181_v8  ;;  %v1573_v10 = vsel %vm420_vm0, 1.0, %v2181_v8 }
  0x39   :  { %v389_v38 = vrot.slane %v388_v49, 1  ;;  %v1563_v35 = vpop.eup %963  ;;  %v1577_v41 = vmul.f32 %v1518_v26, %v1243_v60  ;;  %v1581_v53 = vmul.f32 %v1526_v30, %v1260_v5  ;;  %v245_v11 = vadd.f32 %v1546_v22, %v237_v15 }
  0x3a   :  { %v1583_v19 = vpop.eup %965  ;;  %v381_v14 = vadd.f32 %v380_v50, %v379_v12  ;;  %v1591_v47 = vmul.f32 %v1536_v28, %v1265_v21  ;;  %v1598_v5 = vmul.f32 %v1544_v58, %v1268_v25  ;;  %v1602_v15 = vmul.f32 %v1553_v42, %v1279_v43 }
  0x3b   :  { %2184 = vst [vmem:[#allocation45_spill] sm:$0xff] %v1577_v41  ;;  %2185 = vst [vmem:[#allocation46_spill] sm:$0xff] %v1581_v53  ;;  %v390_v0 = vadd.f32 %v389_v38, %v388_v49  ;;  %v1593_v60 = vpop.eup %967  ;;  %v246_v41 = vadd.f32 %v1555_v36, %v238_v51  ;;  %v1606_v12 = vmul.f32 %v1561_v2, %v1281_v6  ;;  %vm547_vm1 = vcmp.eq.s32.totalorder %v1237_v57, 2 }
  0x3c   :  { %2186 = vst [vmem:[#allocation47_spill] sm:$0xff] %v1591_v47  ;;  %2187 = vst [vmem:[#allocation48_spill] sm:$0xff] %v1593_v60  ;;  %v1608_v49 = vpop.eup %969  ;;  %v1611_v21 = vadd.f32 %v1593_v60, %v241_v59  ;;  %v1616_v51 = vmul.f32 %v1568_v52, %v1283_v23  ;;  %v1620_v25 = vmul.f32 %v1573_v10, %v1285_v7  ;;  %vm548_vm2 = vcmp.eq.s32.totalorder %v1245_v61, 2  ;;  %v2215_v60 = vld [vmem:[#allocation34_spill] sm:$0xff]  ;;  %v2223_v61 = vld [vmem:[#allocation29_spill] sm:$0xff] }
  0x3d   :  { %2188 = vst [vmem:[#allocation49_spill] sm:$0xff] %v1598_v5  ;;  %2189 = vst [vmem:[#allocation50_spill] sm:$0xff] %v1602_v15  ;;  %v393_v50 = vsel %vm342_vm14, %v390_v0, %v381_v14  ;;  %v1622_v43 = vpop.eup %971  ;;  %v1625_v6 = vadd.f32 %v1608_v49, %v242_v33  ;;  %v507_v59 = vadd.f32 %v1526_v30, %v1518_v26  ;;  %vm549_vm3 = vcmp.eq.s32.totalorder %v1247_v62, 2  ;;  %v2222_v62 = vld [vmem:[#allocation42_spill] sm:$0xff] }
  0x3e   :  { %2190 = vst [vmem:[#allocation51_spill] sm:$0xff] %v1606_v12  ;;  %2191 = vst [vmem:[#allocation52_spill] sm:$0xff] %v1608_v49  ;;  %v395_v38 = vadd.f32 %v393_v50, %v372_v27  ;;  %v516_v0 = vadd.f32 %v1561_v2, %v1553_v42  ;;  %v1631_v14 = vpop.eup %973  ;;  %v247_v23 = vadd.f32 %v1563_v35, %v239_v40  ;;  %983 = vrcp.f32 %v1611_v21 }
  0x3f   :  { %2192 = vst [vmem:[#allocation53_spill] sm:$0xff] %v1611_v21  ;;  %2193 = vst [vmem:[#allocation54_spill] sm:$0xff] %v1616_v51  ;;  %v248_v51 = vadd.f32 %v1583_v19, %v240_v9  ;;  %v1636_v7 = vadd.f32 %v1622_v43, %v243_v31  ;;  %v1639_v33 = vpop.eup %975  ;;  %v1642_v27 = vadd.f32 %v1631_v14, %v244_v56  ;;  %985 = vrcp.f32 %v1625_v6 }
  0x40   :  { %2194 = vst [vmem:[#allocation55_spill] sm:$0xff] %v1620_v25  ;;  %2195 = vst [vmem:[#allocation56_spill] sm:$0xff] %v1622_v43  ;;  %v508_v40 = vadd.f32 %v1536_v28, %v507_v59  ;;  %v517_v9 = vadd.f32 %v1568_v52, %v516_v0  ;;  %v1650_v50 = vpop.eup %977  ;;  %v1653_v31 = vadd.f32 %v1639_v33, %v245_v11  ;;  %vm550_vm4 = vcmp.eq.s32.totalorder %v1249_v63, 2 }
  0x41   :  { %2196 = vst [vmem:[#allocation57_spill] sm:$0xff] %v1625_v6  ;;  %2197 = vst [vmem:[#allocation58_spill] sm:$0xff] %v1631_v14  ;;  %987 = vrcp.f32 %v1636_v7  ;;  %v1658_v56 = vpop.eup %979  ;;  %v1661_v25 = vadd.f32 %v1650_v50, %v246_v41  ;;  %vm551_vm5 = vcmp.eq.s32.totalorder %v1251_v1, 2  ;;  %vm552_vm6 = vcmp.eq.s32.totalorder %v1253_v16, 2  ;;  %v2219_v16 = vld [vmem:[#allocation38_spill] sm:$0xff]  ;;  %v2220_v1 = vld [vmem:[#allocation27_spill] sm:$0xff] }
  0x42   :  { %2198 = vst [vmem:[#allocation59_spill] sm:$0xff] %v1636_v7  ;;  %2199 = vst [vmem:[#allocation60_spill] sm:$0xff] %v1639_v33  ;;  %989 = vrcp.f32 %v1642_v27  ;;  %v518_v59 = vadd.f32 %v1573_v10, %v517_v9  ;;  %v1666_v0 = vpop.eup %981  ;;  %v1669_v11 = vadd.f32 %v1658_v56, %v247_v23  ;;  %vm553_vm7 = vcmp.eq.s32.totalorder %v1255_v3, 2 }
  0x43   :  { %2200 = vst [vmem:[#allocation61_spill] sm:$0xff] %v1642_v27  ;;  %396 = vst [vmem:[%s2071_s4] sm:$0x3] %v395_v38  ;;  %v509_v38 = vadd.f32 %v1544_v58, %v508_v40  ;;  %991 = vrcp.f32 %v1653_v31  ;;  %v1675_v41 = vadd.f32 %v1666_v0, %v248_v51  ;;  %vm554_vm8 = vcmp.eq.s32.totalorder %v1257_v4, 2 }
  0x44   :  { %2201 = vst [vmem:[#allocation62_spill] sm:$0xff] %v1650_v50  ;;  %2202 = vst [vmem:[#allocation63_spill] sm:$0xff] %v1653_v31  ;;  %993 = vrcp.f32 %v1661_v25  ;;  %v519_v40 = vrot.slane %v518_v59, 4  ;;  %v1687_v51 = vsel %vm547_vm1, 1.0, %v2181_v8  ;;  %v1692_v15 = vsel %vm548_vm2, 1.0, %v2181_v8 }
  0x45   :  { %2203 = vst [vmem:[#allocation64_spill] sm:$0xff] %v1658_v56  ;;  %2204 = vst [vmem:[#allocation65_spill] sm:$0xff] %v1661_v25  ;;  %v510_v12 = vrot.slane %v509_v38, 4  ;;  %995 = vrcp.f32 %v1669_v11  ;;  %v1697_v5 = vsel %vm549_vm3, 1.0, %v2181_v8  ;;  %v1708_v47 = vsel %vm552_vm6, 1.0, %v2181_v8 }
  0x46   :  { %2205 = vst [vmem:[#allocation66_spill] sm:$0xff] %v1666_v0  ;;  %2206 = vst [vmem:[#allocation67_spill] sm:$0xff] %v1669_v11  ;;  %997 = vrcp.f32 %v1675_v41  ;;  %v520_v9 = vadd.f32 %v519_v40, %v518_v59  ;;  %v1705_v40 = vsel %vm551_vm5, 1.0, %v2181_v8  ;;  %v1716_v11 = vsel %vm554_vm8, 1.0, %v2181_v8 }
  0x47   :  { %2207 = vst [vmem:[#allocation68_spill] sm:$0xff] %v1675_v41  ;;  %v511_v23 = vadd.f32 %v510_v12, %v509_v38  ;;  %v1702_v12 = vsel %vm550_vm4, 1.0, %v2181_v8  ;;  %v1713_v41 = vsel %vm553_vm7, 1.0, %v2181_v8  ;;  %2210 = vst [vmem:[#allocation71_spill] sm:$0xff] %v1716_v11  ;;  %v1720_v25 = vadd.f32 %v1692_v15, %v1687_v51  ;;  %v2217_v8 = vld [vmem:[#allocation40_spill] sm:$0xff] }
  0x48   :  { %v521_v59 = vrot.slane %v520_v9, 2  ;;  %v1710_v53 = vpop.eup %983  ;;  %2209 = vst [vmem:[#allocation70_spill] sm:$0xff] %v1713_v41  ;;  %v1724_v31 = vadd.f32 %v1708_v47, %v1705_v40  ;;  %vm681_vm9 = vcmp.eq.s32.totalorder %v1237_v57, 3 }
  0x49   :  { %v512_v38 = vrot.slane %v511_v23, 2  ;;  %2208 = vst [vmem:[#allocation69_spill] sm:$0xff] %v1710_v53  ;;  %2211 = vst [vmem:[#allocation72_spill] sm:$0xff] %v1720_v25  ;;  %v1726_v27 = vpop.eup %985  ;;  %v305_v7 = vmul.f32 %v1710_v53, %v1376_v37  ;;  %v437_v6 = vmul.f32 %v1710_v53, %v1458_v48  ;;  %v1744_v14 = vmul.f32 %v1710_v53, %v1508_v24 }
  0x4a   :  { %2212 = vst [vmem:[#allocation73_spill] sm:$0xff] %v1724_v31  ;;  %2213 = vst [vmem:[#allocation74_spill] sm:$0xff] %v1726_v27  ;;  %v1734_v0 = vadd.f32 %v521_v59, %v520_v9  ;;  %v306_v50 = vmul.f32 %v1726_v27, %v1381_v44  ;;  %v438_v33 = vmul.f32 %v1726_v27, %v1465_v54 }
  0x4b   :  { %v1732_v21 = vadd.f32 %v512_v38, %v511_v23  ;;  %v1736_v56 = vpop.eup %987  ;;  %v1748_v37 = vmul.f32 %v1726_v27, %v1520_v17  ;;  %v314_v9 = vmul.f32 %v1389_v46, %v305_v7  ;;  %v447_v54 = vmul.f32 %v1518_v26, %v437_v6 }
  0x4c   :  { %v1750_v48 = vpop.eup %989  ;;  %v307_v23 = vmul.f32 %v1736_v56, %v1386_v45  ;;  %v439_v44 = vmul.f32 %v1736_v56, %v1470_v55  ;;  %v315_v17 = vmul.f32 %v1392_v32, %v306_v50  ;;  %v348_v59 = vadd.f32 %v306_v50, %v305_v7 }
  0x4d   :  { %v1758_v38 = vpop.eup %991  ;;  %v308_v24 = vmul.f32 %v1750_v48, %v1397_v34  ;;  %v440_v43 = vmul.f32 %v1750_v48, %v1478_v18  ;;  %v448_v55 = vmul.f32 %v1526_v30, %v438_v33  ;;  %v2214_v34 = vld [vmem:[#allocation25_spill] sm:$0xff] }
  0x4e   :  { %v1765_v27 = vpop.eup %993  ;;  %v309_v45 = vmul.f32 %v1758_v38, %v1408_v13  ;;  %v316_v46 = vmul.f32 %v1395_v39, %v307_v23  ;;  %v441_v26 = vmul.f32 %v1758_v38, %v1484_v20  ;;  %v322_v18 = vadd.f32 %v315_v17, %v314_v9  ;;  %v2216_v39 = vld [vmem:[#allocation26_spill] sm:$0xff]  ;;  %v2218_v30 = vld [vmem:[#allocation41_spill] sm:$0xff]  ;;  %v2221_v17 = vld [vmem:[#allocation28_spill] sm:$0xff] }
  0x4f   :  { %v1773_v49 = vpop.eup %995  ;;  %v310_v32 = vmul.f32 %v1765_v27, %v1420_v29  ;;  %v317_v7 = vmul.f32 %v2214_v34, %v308_v24  ;;  %v349_v50 = vadd.f32 %v348_v59, %v307_v23  ;;  %v442_v20 = vmul.f32 %v1765_v27, %v2217_v8 }
  0x50   :  { %v1778_v53 = vpop.eup %997  ;;  %v311_v13 = vmul.f32 %v1773_v49, %v2215_v60  ;;  %v318_v4 = vmul.f32 %v2216_v39, %v309_v45  ;;  %v443_v3 = vmul.f32 %v1773_v49, %v2218_v30  ;;  %v323_v9 = vadd.f32 %v322_v18, %v316_v46 }
  0x51   :  { %v312_v29 = vmul.f32 %v1778_v53, %v2219_v16  ;;  %v319_v34 = vmul.f32 %v2220_v1, %v310_v32  ;;  %v350_v23 = vadd.f32 %v349_v50, %v308_v24  ;;  %v357_v63 = vadd.f32 %v310_v32, %v309_v45 }
  0x52   :  { %v320_v59 = vmul.f32 %v2221_v17, %v311_v13  ;;  %v444_v60 = vmul.f32 %v1778_v53, %v2222_v62  ;;  %v449_v39 = vmul.f32 %v1536_v28, %v439_v44  ;;  %v324_v31 = vadd.f32 %v323_v9, %v317_v7 }
  0x53   :  { %v321_v8 = vmul.f32 %v2223_v61, %v312_v29  ;;  %v331_v11 = vadd.f32 %v319_v34, %v318_v4  ;;  %v351_v30 = vrot.slane %v350_v23, 4  ;;  %v358_v25 = vadd.f32 %v357_v63, %v311_v13 }
  0x54   :  { %v450_v16 = vmul.f32 %v1544_v58, %v440_v43  ;;  %v451_v1 = vmul.f32 %v1553_v42, %v441_v26  ;;  %v452_v24 = vmul.f32 %v1561_v2, %v442_v20  ;;  %v325_v46 = vrot.slane %v324_v31, 4 }
  0x55   :  { %v332_v18 = vadd.f32 %v331_v11, %v320_v59  ;;  %v352_v45 = vadd.f32 %v351_v30, %v350_v23  ;;  %v453_v32 = vmul.f32 %v1568_v52, %v443_v3  ;;  %v359_v62 = vadd.f32 %v358_v25, %v312_v29 }
  0x56   :  { %v454_v28 = vmul.f32 %v1573_v10, %v444_v60  ;;  %v455_v50 = vadd.f32 %v448_v55, %v447_v54  ;;  %v464_v61 = vadd.f32 %v452_v24, %v451_v1  ;;  %v326_v7 = vadd.f32 %v325_v46, %v324_v31 }
  0x57   :  { %v333_v4 = vadd.f32 %v332_v18, %v321_v8  ;;  %v353_v34 = vrot.slane %v352_v45, 2  ;;  %v481_v63 = vadd.f32 %v438_v33, %v437_v6  ;;  %v360_v13 = vrot.slane %v359_v62, 4 }
  0x58   :  { %v456_v58 = vadd.f32 %v455_v50, %v449_v39  ;;  %v465_v9 = vadd.f32 %v464_v61, %v453_v32  ;;  %v490_v42 = vadd.f32 %v442_v20, %v441_v26  ;;  %v327_v17 = vrot.slane %v326_v7, 2 }
  0x59   :  { %v334_v2 = vrot.slane %v333_v4, 4  ;;  %v354_v41 = vadd.f32 %v353_v34, %v352_v45  ;;  %v482_v11 = vadd.f32 %v481_v63, %v439_v44  ;;  %v361_v23 = vadd.f32 %v360_v13, %v359_v62 }
  0x5a   :  { %v457_v59 = vadd.f32 %v456_v58, %v450_v16  ;;  %v466_v52 = vadd.f32 %v465_v9, %v454_v28  ;;  %v491_v25 = vadd.f32 %v490_v42, %v443_v3  ;;  %v328_v29 = vadd.f32 %v327_v17, %v326_v7  ;;  %v347_v7 = vld [vmem:[%s2070_s3] sm:$0x3] }
  0x5b   :  { %v335_v10 = vadd.f32 %v334_v2, %v333_v4  ;;  %v355_v54 = vrot.slane %v354_v41, 1  ;;  %v483_v55 = vadd.f32 %v482_v11, %v440_v43  ;;  %v362_v31 = vrot.slane %v361_v23, 2  ;;  %v313_v58 = vld [vmem:[%s2069_s2] sm:$0x3]  ;;  %v2224_v2 = vld [vmem:[#allocation43_spill] sm:$0xff] }
  0x5c   :  { %v458_v8 = vrot.slane %v457_v59, 4  ;;  %v467_v30 = vrot.slane %v466_v52, 4  ;;  %v492_v6 = vadd.f32 %v491_v25, %v444_v60  ;;  %v329_v33 = vrot.slane %v328_v29, 1  ;;  %v888_v25 = vld [vmem:[%s2071_s4 + $0x2] sm:$0x3] }
  0x5d   :  { %v336_v39 = vrot.slane %v335_v10, 2  ;;  %v356_v1 = vadd.f32 %v355_v54, %v354_v41  ;;  %v484_v26 = vrot.slane %v483_v55, 4  ;;  %v363_v20 = vadd.f32 %v362_v31, %v361_v23 }
  0x5e   :  { %v459_v24 = vadd.f32 %v458_v8, %v457_v59  ;;  %v468_v46 = vadd.f32 %v467_v30, %v466_v52  ;;  %v493_v44 = vrot.slane %v492_v6, 4  ;;  %v330_v18 = vadd.f32 %v329_v33, %v328_v29 }
  0x5f   :  { %v337_v16 = vadd.f32 %v336_v39, %v335_v10  ;;  %v485_v45 = vadd.f32 %v484_v26, %v483_v55  ;;  %v514_v3 = vrot.slane %v1732_v21, 1  ;;  %v364_v32 = vrot.slane %v363_v20, 1 }
  0x60   :  { %v460_v62 = vrot.slane %v459_v24, 2  ;;  %v469_v43 = vrot.slane %v468_v46, 2  ;;  %v494_v28 = vadd.f32 %v493_v44, %v492_v6  ;;  %v523_v41 = vrot.slane %v1734_v0, 1 }
  0x61   :  { %v338_v50 = vrot.slane %v337_v16, 1  ;;  %v486_v61 = vrot.slane %v485_v45, 2  ;;  %v515_v60 = vadd.f32 %v514_v3, %v1732_v21  ;;  %v365_v4 = vadd.f32 %v364_v32, %v363_v20 }
  0x62   :  { %v461_v34 = vadd.f32 %v460_v62, %v459_v24  ;;  %v470_v63 = vadd.f32 %v469_v43, %v468_v46  ;;  %v495_v13 = vrot.slane %v494_v28, 2  ;;  %v524_v17 = vadd.f32 %v523_v41, %v1734_v0  ;;  %v884_v0 = vld [vmem:[%s2069_s2 + $0x2] sm:$0x3] }
  0x63   :  { %v339_v9 = vadd.f32 %v338_v50, %v337_v16  ;;  %v487_v42 = vadd.f32 %v486_v61, %v485_v45  ;;  %v573_v21 = vmul.f32 %v1736_v56, %v2224_v2  ;;  %v368_v11 = vsel %vm342_vm14, %v365_v4, %v356_v1  ;;  %v2225_v1 = vld [vmem:[#allocation44_spill] sm:$0xff]  ;;  %v886_v46 = vld [vmem:[%s2070_s3 + $0x2] sm:$0x3] }
  0x64   :  { %v462_v23 = vrot.slane %v461_v34, 1  ;;  %v471_v59 = vrot.slane %v470_v63, 1  ;;  %v496_v52 = vadd.f32 %v495_v13, %v494_v28  ;;  %v370_v10 = vadd.f32 %v368_v11, %v347_v7  ;;  %v2226_v50 = vld [vmem:[#allocation70_spill] sm:$0xff]  ;;  %v2227_v4 = vld [vmem:[#allocation72_spill] sm:$0xff] }
  0x65   :  { %v343_v29 = vsel %vm342_vm14, %v339_v9, %v330_v18  ;;  %v488_v54 = vrot.slane %v487_v42, 1  ;;  %v527_v55 = vsel %vm342_vm14, %v524_v17, %v515_v60  ;;  %v574_v26 = vmul.f32 %v1750_v48, %v2225_v1  ;;  %v2229_v9 = vld [vmem:[#allocation73_spill] sm:$0xff]  ;;  %v2230_v17 = vld [vmem:[#allocation2_spill] sm:$0xff] }
  0x66   :  { %v345_v31 = vadd.f32 %v343_v29, %v313_v58  ;;  %v463_v8 = vadd.f32 %v462_v23, %v461_v34  ;;  %v472_v30 = vadd.f32 %v471_v59, %v470_v63  ;;  %v497_v6 = vrot.slane %v496_v52, 1  ;;  %371 = vst [vmem:[%s2070_s3] sm:$0x3] %v370_v10  ;;  %v2228_v63 = vld [vmem:[#allocation71_spill] sm:$0xff] }
  0x67   :  { %v489_v33 = vadd.f32 %v488_v54, %v487_v42  ;;  %v529_v39 = vadd.f32 %v888_v25, %v527_v55  ;;  %v575_v20 = vmul.f32 %v1758_v38, %v1546_v22  ;;  %v576_v18 = vmul.f32 %v1765_v27, %v1555_v36  ;;  %v2232_v25 = vld [vmem:[#allocation4_spill] sm:$0xff] }
  0x68   :  { %346 = vst [vmem:[%s2069_s2] sm:$0x3] %v345_v31  ;;  %v475_v24 = vsel %vm342_vm14, %v472_v30, %v463_v8  ;;  %v498_v44 = vadd.f32 %v497_v6, %v496_v52  ;;  %v577_v16 = vmul.f32 %v1773_v49, %v1563_v35  ;;  %v578_v22 = vmul.f32 %v1778_v53, %v1583_v19  ;;  %v2231_v52 = vld [vmem:[#allocation3_spill] sm:$0xff]  ;;  %v2233_v8 = vld [vmem:[#allocation5_spill] sm:$0xff]  ;;  %v2234_v30 = vld [vmem:[#allocation6_spill] sm:$0xff] }
  0x69   :  { %v477_v45 = vadd.f32 %v884_v0, %v475_v24  ;;  %889 = vst [vmem:[%s2071_s4 + $0x2] sm:$0x3] %v529_v39  ;;  %v581_v3 = vmul.f32 %v1687_v51, %v1744_v14  ;;  %v582_v32 = vmul.f32 %v1692_v15, %v1748_v37  ;;  %v583_v36 = vmul.f32 %v1697_v5, %v573_v21  ;;  %v2235_v24 = vld [vmem:[#allocation7_spill] sm:$0xff] }
  0x6a   :  { %v501_v62 = vsel %vm342_vm14, %v498_v44, %v489_v33  ;;  %v585_v35 = vmul.f32 %v1705_v40, %v575_v20  ;;  %v584_v19 = vmul.f32 %v1702_v12, %v574_v26  ;;  %v586_v28 = vmul.f32 %v1708_v47, %v576_v18 }
  0x6b   :  { %885 = vst [vmem:[%s2069_s2 + $0x2] sm:$0x3] %v477_v45  ;;  %v503_v43 = vadd.f32 %v886_v46, %v501_v62  ;;  %v587_v61 = vmul.f32 %v2226_v50, %v577_v16  ;;  %v589_v60 = vadd.f32 %v582_v32, %v581_v3  ;;  %v615_v41 = vadd.f32 %v1748_v37, %v1744_v14  ;;  %v2237_v32 = vld [vmem:[#allocation8_spill] sm:$0xff] }
  0x6c   :  { %v624_v7 = vadd.f32 %v576_v18, %v575_v20  ;;  %v642_v34 = vadd.f32 %v1697_v5, %v2227_v4  ;;  %v588_v13 = vmul.f32 %v2228_v63, %v578_v22  ;;  %v598_v58 = vadd.f32 %v586_v28, %v585_v35 }
  0x6d   :  { %887 = vst [vmem:[%s2070_s3 + $0x2] sm:$0x3] %v503_v43  ;;  %v651_v42 = vadd.f32 %v2226_v50, %v2229_v9  ;;  %vm682_vm10 = vcmp.eq.s32.totalorder %v2230_v17, 3  ;;  %v590_v2 = vadd.f32 %v589_v60, %v583_v36  ;;  %v616_v11 = vadd.f32 %v615_v41, %v573_v21 }
  0x6e   :  { %v625_v23 = vadd.f32 %v624_v7, %v577_v16  ;;  %v643_v14 = vadd.f32 %v1702_v12, %v642_v34  ;;  %v599_v37 = vadd.f32 %v598_v58, %v587_v61  ;;  %vm683_vm11 = vcmp.eq.s32.totalorder %v2231_v52, 3 }
  0x6f   :  { %v652_v59 = vadd.f32 %v2228_v63, %v651_v42  ;;  %vm684_vm12 = vcmp.eq.s32.totalorder %v2232_v25, 3  ;;  %v591_v29 = vadd.f32 %v590_v2, %v584_v19  ;;  %v617_v10 = vadd.f32 %v616_v11, %v574_v26  ;;  %v2238_v25 = vld [vmem:[#allocation48_spill] sm:$0xff] }
  0x70   :  { %v626_v54 = vadd.f32 %v625_v23, %v578_v22  ;;  %v644_v55 = vrot.slane %v643_v14, 4  ;;  %v600_v31 = vadd.f32 %v599_v37, %v588_v13  ;;  %vm685_vm13 = vcmp.eq.s32.totalorder %v2233_v8, 3  ;;  %v900_v8 = vld [vmem:[%s2070_s3 + $0x4] sm:$0x3] }
  0x71   :  { %v653_v0 = vrot.slane %v652_v59, 4  ;;  %vm686_vm15 = vcmp.eq.s32.totalorder %v2234_v30, 3  ;;  %v592_v21 = vrot.slane %v591_v29, 4  ;;  %v618_v6 = vrot.slane %v617_v10, 4 }
  0x72   :  { %v627_v33 = vrot.slane %v626_v54, 4  ;;  %v645_v39 = vadd.f32 %v644_v55, %v643_v14  ;;  %v601_v1 = vrot.slane %v600_v31, 4  ;;  %vm687_vm0 = vcmp.eq.s32.totalorder %v2235_v24, 3  ;;  %v2241_v55 = vld [vmem:[#allocation74_spill] sm:$0xff] }
  0x73   :  { %v654_v20 = vadd.f32 %v653_v0, %v652_v59  ;;  %v2236_v46 = vmov 0.0   ;;  %v593_v44 = vadd.f32 %v592_v21, %v591_v29  ;;  %v619_v18 = vadd.f32 %v618_v6, %v617_v10  ;;  %v902_v59 = vld [vmem:[%s2071_s4 + $0x4] sm:$0x3]  ;;  %v2239_v29 = vld [vmem:[#allocation69_spill] sm:$0xff]  ;;  %v2242_v6 = vld [vmem:[#allocation56_spill] sm:$0xff] }
  0x74   :  { %v1879_v26 = vsel %vm681_vm9, 1.0, %v2236_v46  ;;  %v628_v16 = vadd.f32 %v627_v33, %v626_v54  ;;  %v646_v45 = vrot.slane %v645_v39, 2  ;;  %v602_v22 = vadd.f32 %v601_v1, %v600_v31  ;;  %v2240_v54 = vld [vmem:[#allocation52_spill] sm:$0xff]  ;;  %v2243_v24 = vld [vmem:[#allocation58_spill] sm:$0xff] }
  0x75   :  { %v655_v3 = vrot.slane %v654_v20, 2  ;;  %vm688_vm1 = vcmp.eq.s32.totalorder %v2237_v32, 3  ;;  %v1885_v62 = vsel %vm682_vm10, 1.0, %v2236_v46  ;;  %v1890_v36 = vsel %vm683_vm11, 1.0, %v2236_v46 }
  0x76   :  { %v594_v57 = vrot.slane %v593_v44, 2  ;;  %v620_v35 = vrot.slane %v619_v18, 2  ;;  %v629_v43 = vrot.slane %v628_v16, 2  ;;  %v647_v19 = vadd.f32 %v646_v45, %v645_v39  ;;  %v898_v39 = vld [vmem:[%s2069_s2 + $0x4] sm:$0x3] }
  0x77   :  { %v603_v28 = vrot.slane %v602_v22, 2  ;;  %v656_v61 = vadd.f32 %v655_v3, %v654_v20  ;;  %v1895_v60 = vsel %vm684_vm12, 1.0, %v2236_v46  ;;  %v1900_v41 = vsel %vm685_vm13, 1.0, %v2236_v46  ;;  %v2245_v3 = vld [vmem:[#allocation62_spill] sm:$0xff] }
  0x78   :  { %v595_v7 = vadd.f32 %v594_v57, %v593_v44  ;;  %v621_v4 = vadd.f32 %v620_v35, %v619_v18  ;;  %v630_v34 = vadd.f32 %v629_v43, %v628_v16  ;;  %v648_v13 = vrot.slane %v647_v19, 1  ;;  %v2244_v18 = vld [vmem:[#allocation60_spill] sm:$0xff] }
  0x79   :  { %v604_v58 = vadd.f32 %v603_v28, %v602_v22  ;;  %v657_v9 = vrot.slane %v656_v61, 1  ;;  %v1905_v42 = vsel %vm686_vm15, 1.0, %v2236_v46  ;;  %v1910_v17 = vsel %vm687_vm0, 1.0, %v2236_v46  ;;  %v2247_v28 = vld [vmem:[#allocation66_spill] sm:$0xff] }
  0x7a   :  { %v596_v2 = vrot.slane %v595_v7, 1  ;;  %v622_v11 = vrot.slane %v621_v4, 1  ;;  %v631_v23 = vrot.slane %v630_v34, 1  ;;  %v649_v14 = vadd.f32 %v648_v13, %v647_v19 }
  0x7b   :  { %v605_v37 = vrot.slane %v604_v58, 1  ;;  %v658_v52 = vadd.f32 %v657_v9, %v656_v61  ;;  %v705_v10 = vmul.f32 %v2239_v29, %v2238_v25  ;;  %v706_v31 = vmul.f32 %v2241_v55, %v2240_v54  ;;  %v2249_v54 = vld [vmem:[#allocation57_spill] sm:$0xff] }
  0x7c   :  { %v597_v0 = vadd.f32 %v596_v2, %v595_v7  ;;  %v623_v30 = vadd.f32 %v622_v11, %v621_v4  ;;  %v632_v21 = vadd.f32 %v631_v23, %v630_v34  ;;  %v707_v33 = vmul.f32 %v1736_v56, %v2242_v6  ;;  %v2246_v56 = vld [vmem:[#allocation64_spill] sm:$0xff]  ;;  %v2250_v55 = vld [vmem:[#allocation9_spill] sm:$0xff] }
  0x7d   :  { %v606_v1 = vadd.f32 %v605_v37, %v604_v58  ;;  %v661_v20 = vsel %vm342_vm14, %v658_v52, %v649_v14  ;;  %v708_v44 = vmul.f32 %v1750_v48, %v2243_v24  ;;  %v709_v16 = vmul.f32 %v1758_v38, %v2244_v18  ;;  %v2248_v14 = vld [vmem:[#allocation53_spill] sm:$0xff] }
  0x7e   :  { %v635_v45 = vsel %vm342_vm14, %v632_v21, %v623_v30  ;;  %v663_v22 = vadd.f32 %v902_v59, %v661_v20  ;;  %v710_v57 = vmul.f32 %v1765_v27, %v2245_v3  ;;  %v711_v35 = vmul.f32 %v1773_v49, %v2246_v56  ;;  %v2253_v3 = vld [vmem:[#allocation61_spill] sm:$0xff] }
  0x7f   :  { %v609_v43 = vsel %vm342_vm14, %v606_v1, %v597_v0  ;;  %v637_v19 = vadd.f32 %v900_v8, %v635_v45  ;;  %v712_v61 = vmul.f32 %v1778_v53, %v2247_v28  ;;  %v715_v48 = vmul.f32 %v1879_v26, %v705_v10  ;;  %v2252_v1 = vld [vmem:[#allocation10_spill] sm:$0xff] }
  0x80   :  { %v611_v7 = vadd.f32 %v898_v39, %v609_v43  ;;  %903 = vst [vmem:[%s2071_s4 + $0x4] sm:$0x3] %v663_v22  ;;  %v1947_v27 = vsel %vm688_vm1, 1.0, %v2236_v46  ;;  %v716_v49 = vmul.f32 %v1885_v62, %v706_v31  ;;  %v717_v38 = vmul.f32 %v1890_v36, %v707_v33  ;;  %v2251_v39 = vld [vmem:[#allocation59_spill] sm:$0xff] }
  0x81   :  { %901 = vst [vmem:[%s2070_s3 + $0x4] sm:$0x3] %v637_v19  ;;  %v718_v53 = vmul.f32 %v1895_v60, %v708_v44  ;;  %v719_v4 = vmul.f32 %v1900_v41, %v709_v16  ;;  %v720_v34 = vmul.f32 %v1905_v42, %v710_v57  ;;  %v721_v13 = vmul.f32 %v1910_v17, %v711_v35 }
  0x82   :  { %899 = vst [vmem:[%s2069_s2 + $0x4] sm:$0x3] %v611_v7  ;;  %v723_v46 = vadd.f32 %v716_v49, %v715_v48  ;;  %v749_v32 = vadd.f32 %v706_v31, %v705_v10  ;;  %v758_v58 = vadd.f32 %v710_v57, %v709_v16  ;;  %v775_v9 = vadd.f32 %v1885_v62, %v1879_v26  ;;  %v2256_v48 = vld [vmem:[#allocation12_spill] sm:$0xff] }
  0x83   :  { %v722_v2 = vmul.f32 %v1947_v27, %v712_v61  ;;  %v732_v11 = vadd.f32 %v720_v34, %v719_v4  ;;  %v784_v23 = vadd.f32 %v1905_v42, %v1900_v41  ;;  %999 = vlog2.f32 %v2248_v14 }
  0x84   :  { %v724_v37 = vadd.f32 %v723_v46, %v717_v38  ;;  %v750_v59 = vadd.f32 %v749_v32, %v707_v33  ;;  %v759_v52 = vadd.f32 %v758_v58, %v711_v35  ;;  %v776_v25 = vadd.f32 %v1890_v36, %v775_v9  ;;  %v2257_v46 = vld [vmem:[#allocation65_spill] sm:$0xff] }
  0x85   :  { %v733_v29 = vadd.f32 %v732_v11, %v721_v13  ;;  %v785_v10 = vadd.f32 %v1910_v17, %v784_v23  ;;  %1001 = vlog2.f32 %v2249_v54  ;;  %v1972_v31 = vmul.f32 %v1687_v51, %v2250_v55  ;;  %v2258_v32 = vld [vmem:[#allocation13_spill] sm:$0xff] }
  0x86   :  { %v725_v0 = vadd.f32 %v724_v37, %v718_v53  ;;  %v751_v8 = vadd.f32 %v750_v59, %v708_v44  ;;  %v760_v30 = vadd.f32 %v759_v52, %v712_v61  ;;  %v777_v21 = vadd.f32 %v1895_v60, %v776_v25  ;;  %v2254_v44 = vld [vmem:[#allocation11_spill] sm:$0xff] }
  0x87   :  { %v734_v6 = vadd.f32 %v733_v29, %v722_v2  ;;  %v786_v33 = vadd.f32 %v1947_v27, %v785_v10  ;;  %1003 = vlog2.f32 %v2251_v39  ;;  %v1979_v20 = vmul.f32 %v1692_v15, %v2252_v1  ;;  %v2255_v15 = vld [vmem:[#allocation63_spill] sm:$0xff] }
  0x88   :  { %v726_v24 = vrot.slane %v725_v0, 4  ;;  %v752_v18 = vrot.slane %v751_v8, 4  ;;  %v761_v16 = vrot.slane %v760_v30, 4  ;;  %v778_v45 = vrot.slane %v777_v21, 4  ;;  %v2259_v52 = vld [vmem:[#allocation67_spill] sm:$0xff] }
  0x89   :  { %v735_v51 = vrot.slane %v734_v6, 4  ;;  %v787_v22 = vrot.slane %v786_v33, 4  ;;  %1005 = vlog2.f32 %v2253_v3  ;;  %v1984_v57 = vmul.f32 %v1697_v5, %v2254_v44  ;;  %v2261_v3 = vld [vmem:[#allocation30_spill] sm:$0xff] }
  0x8a   :  { %v727_v56 = vadd.f32 %v726_v24, %v725_v0  ;;  %v753_v35 = vadd.f32 %v752_v18, %v751_v8  ;;  %v762_v43 = vadd.f32 %v761_v16, %v760_v30  ;;  %v779_v19 = vadd.f32 %v778_v45, %v777_v21  ;;  %v912_v18 = vld [vmem:[%s2069_s2 + $0x6] sm:$0x3] }
  0x8b   :  { %v736_v28 = vadd.f32 %v735_v51, %v734_v6  ;;  %v788_v61 = vadd.f32 %v787_v22, %v786_v33  ;;  %1007 = vlog2.f32 %v2255_v15  ;;  %v1989_v7 = vmul.f32 %v1702_v12, %v2256_v48  ;;  %v914_v6 = vld [vmem:[%s2070_s3 + $0x6] sm:$0x3] }
  0x8c   :  { %v728_v49 = vrot.slane %v727_v56, 2  ;;  %v754_v38 = vrot.slane %v753_v35, 2  ;;  %v763_v53 = vrot.slane %v762_v43, 2  ;;  %v780_v4 = vrot.slane %v779_v19, 2  ;;  %v916_v45 = vld [vmem:[%s2071_s4 + $0x6] sm:$0x3] }
  0x8d   :  { %v1000_v34 = vpop.eup %999  ;;  %v737_v13 = vrot.slane %v736_v28, 2  ;;  %v789_v5 = vrot.slane %v788_v61, 2  ;;  %1009 = vlog2.f32 %v2257_v46  ;;  %v1994_v58 = vmul.f32 %v1705_v40, %v2258_v32  ;;  %v2260_v40 = vld [vmem:[#allocation68_spill] sm:$0xff]  ;;  %v2265_v46 = vld [vmem:[#allocation33_spill] sm:$0xff] }
  0x8e   :  { %v729_v9 = vadd.f32 %v728_v49, %v727_v56  ;;  %v755_v2 = vadd.f32 %v754_v38, %v753_v35  ;;  %v764_v11 = vadd.f32 %v763_v53, %v762_v43  ;;  %v781_v23 = vadd.f32 %v780_v4, %v779_v19  ;;  %v2262_v43 = vld [vmem:[#allocation31_spill] sm:$0xff]  ;;  %v2264_v53 = vld [vmem:[#allocation32_spill] sm:$0xff] }
  0x8f   :  { %v1002_v14 = vpop.eup %1001  ;;  %v738_v12 = vadd.f32 %v737_v13, %v736_v28  ;;  %v790_v37 = vadd.f32 %v789_v5, %v788_v61  ;;  %v266_v59 = vmul.f32 0.6931472, %v1000_v34  ;;  %1011 = vlog2.f32 %v2259_v52  ;;  %v2263_v28 = vld [vmem:[#allocation14_spill] sm:$0xff] }
  0x90   :  { %v730_v25 = vrot.slane %v729_v9, 1  ;;  %v756_v29 = vrot.slane %v755_v2, 1  ;;  %v765_v10 = vrot.slane %v764_v11, 1  ;;  %v782_v54 = vrot.slane %v781_v23, 1 }
  0x91   :  { %v1004_v55 = vpop.eup %1003  ;;  %v739_v0 = vrot.slane %v738_v12, 1  ;;  %v791_v8 = vrot.slane %v790_v37, 1  ;;  %v268_v30 = vmul.f32 0.6931472, %v1002_v14  ;;  %1013 = vlog2.f32 %v2260_v40  ;;  %v2268_v14 = vld [vmem:[#allocation47_spill] sm:$0xff] }
  0x92   :  { %v731_v21 = vadd.f32 %v730_v25, %v729_v9  ;;  %v757_v33 = vadd.f32 %v756_v29, %v755_v2  ;;  %v766_v39 = vadd.f32 %v765_v10, %v764_v11  ;;  %v783_v1 = vadd.f32 %v782_v54, %v781_v23  ;;  %v2266_v2 = vld [vmem:[#allocation45_spill] sm:$0xff]  ;;  %v2267_v11 = vld [vmem:[#allocation46_spill] sm:$0xff]  ;;  %v2270_v25 = vld [vmem:[#allocation35_spill] sm:$0xff] }
  0x93   :  { %v1006_v24 = vpop.eup %1005  ;;  %v740_v16 = vadd.f32 %v739_v0, %v738_v12  ;;  %v792_v51 = vadd.f32 %v791_v8, %v790_v37  ;;  %v270_v22 = vmul.f32 0.6931472, %v1004_v55  ;;  %v405_v44 = vsub.f32 %v266_v59, %v2261_v3  ;;  %v2269_v37 = vld [vmem:[#allocation15_spill] sm:$0xff]  ;;  %v2271_v10 = vld [vmem:[#allocation49_spill] sm:$0xff]  ;;  %v2279_v3 = vld [vmem:[#allocation22_spill] sm:$0xff] }
  0x94   :  { %v769_v56 = vsel %vm342_vm14, %v766_v39, %v757_v33  ;;  %v272_v35 = vmul.f32 0.6931472, %v1006_v24  ;;  %v406_v19 = vsub.f32 %v268_v30, %v2262_v43  ;;  %v670_v61 = vmul.f32 %v1708_v47, %v2263_v28  ;;  %v2272_v55 = vld [vmem:[#allocation17_spill] sm:$0xff]  ;;  %v2274_v39 = vld [vmem:[#allocation36_spill] sm:$0xff]  ;;  %v2275_v24 = vld [vmem:[#allocation50_spill] sm:$0xff] }
  0x95   :  { %v1008_v15 = vpop.eup %1007  ;;  %v743_v48 = vsel %vm342_vm14, %v740_v16, %v731_v21  ;;  %v771_v49 = vadd.f32 %v914_v6, %v769_v56  ;;  %v795_v38 = vsel %vm342_vm14, %v792_v51, %v783_v1  ;;  %v407_v4 = vsub.f32 %v270_v22, %v2264_v53  ;;  %v2273_v21 = vld [vmem:[#allocation18_spill] sm:$0xff]  ;;  %v2276_v51 = vld [vmem:[#allocation19_spill] sm:$0xff]  ;;  %v2277_v22 = vld [vmem:[#allocation20_spill] sm:$0xff] }
  0x96   :  { %v745_v34 = vadd.f32 %v912_v18, %v743_v48  ;;  %v797_v13 = vadd.f32 %v916_v45, %v795_v38  ;;  %v274_v5 = vmul.f32 0.6931472, %v1008_v15  ;;  %v408_v32 = vsub.f32 %v272_v35, %v2265_v46  ;;  %v2280_v56 = vld [vmem:[#allocation37_spill] sm:$0xff]  ;;  %v2281_v43 = vld [vmem:[#allocation51_spill] sm:$0xff]  ;;  %v2282_v28 = vld [vmem:[#allocation16_spill] sm:$0xff] }
  0x97   :  { %v1010_v9 = vpop.eup %1009  ;;  %915 = vst [vmem:[%s2070_s3 + $0x6] sm:$0x3] %v771_v49  ;;  %v539_v47 = vsub.f32 %v405_v44, %v2266_v2  ;;  %v540_v23 = vsub.f32 %v406_v19, %v2267_v11  ;;  %v541_v12 = vsub.f32 %v407_v4, %v2268_v14  ;;  %v671_v59 = vmul.f32 %v2226_v50, %v2269_v37  ;;  %v2284_v38 = vld [vmem:[#allocation39_spill] sm:$0xff]  ;;  %v2285_v53 = vld [vmem:[#allocation54_spill] sm:$0xff]  ;;  %v2287_v2 = vld [vmem:[#allocation24_spill] sm:$0xff] }
  0x98   :  { %913 = vst [vmem:[%s2069_s2 + $0x6] sm:$0x3] %v745_v34  ;;  %917 = vst [vmem:[%s2071_s4 + $0x6] sm:$0x3] %v797_v13  ;;  %v276_v52 = vmul.f32 0.6931472, %v1010_v9  ;;  %v409_v29 = vsub.f32 %v274_v5, %v2270_v25  ;;  %v542_v54 = vsub.f32 %v408_v32, %v2271_v10  ;;  %v799_v0 = vmul.f32 %v1879_v26, %v2272_v55 }
  0x99   :  { %v1012_v8 = vpop.eup %1011  ;;  %v673_v30 = vsub.f32 %v539_v47, %v1972_v31  ;;  %v674_v50 = vsub.f32 %v540_v23, %v1979_v20  ;;  %v675_v40 = vsub.f32 %v541_v12, %v1984_v57  ;;  %v800_v6 = vmul.f32 %v1885_v62, %v2273_v21  ;;  %v2278_v20 = vld [vmem:[#allocation21_spill] sm:$0xff]  ;;  %v2286_v32 = vld [vmem:[#allocation55_spill] sm:$0xff] }
  0x9a   :  { %v278_v33 = vmul.f32 0.6931472, %v1012_v8  ;;  %v410_v1 = vsub.f32 %v276_v52, %v2274_v39  ;;  %v543_v18 = vsub.f32 %v409_v29, %v2275_v24  ;;  %v676_v16 = vsub.f32 %v542_v54, %v1989_v7 }
  0x9b   :  { %v1014_v45 = vpop.eup %1013  ;;  %v801_v26 = vmul.f32 %v1890_v36, %v2276_v51  ;;  %v802_v31 = vmul.f32 %v1895_v60, %v2277_v22  ;;  %v803_v57 = vmul.f32 %v1900_v41, %v2278_v20  ;;  %v804_v62 = vmul.f32 %v1905_v42, %v2279_v3  ;;  %v2283_v36 = vld [vmem:[#allocation23_spill] sm:$0xff] }
  0x9c   :  { %v280_v44 = vmul.f32 0.6931472, %v1014_v45  ;;  %v411_v35 = vsub.f32 %v278_v33, %v2280_v56  ;;  %v544_v19 = vsub.f32 %v410_v1, %v2281_v43  ;;  %v677_v7 = vsub.f32 %v543_v18, %v1994_v58 }
  0x9d   :  { %v672_v15 = vmul.f32 %v2228_v63, %v2282_v28  ;;  %v805_v48 = vmul.f32 %v1910_v17, %v2283_v36  ;;  %v807_v60 = vsub.f32 %v673_v30, %v799_v0  ;;  %v808_v49 = vsub.f32 %v674_v50, %v800_v6 }
  0x9e   :  { %v412_v41 = vsub.f32 %v280_v44, %v2284_v38  ;;  %v545_v4 = vsub.f32 %v411_v35, %v2285_v53  ;;  %v678_v42 = vsub.f32 %v544_v19, %v670_v61  ;;  %v809_v34 = vsub.f32 %v675_v40, %v801_v26  ;;  %v815_v40 = vld [vmem:[%s2072_s5] sm:$0x3] }
  0x9f   :  { %v810_v13 = vsub.f32 %v676_v16, %v802_v31  ;;  %v811_v5 = vsub.f32 %v677_v7, %v803_v57  ;;  %v816_v46 = vadd.f32 %v808_v49, %v807_v60  ;;  %v806_v63 = vmul.f32 %v1947_v27, %v2287_v2 }
  0xa0   :  { %v546_v9 = vsub.f32 %v412_v41, %v2286_v32  ;;  %v679_v58 = vsub.f32 %v545_v4, %v671_v59  ;;  %v812_v47 = vsub.f32 %v678_v42, %v804_v62 }
  0xa1   :  { %v817_v11 = vadd.f32 %v816_v46, %v809_v34 }
  0xa2   :  { %v680_v17 = vsub.f32 %v546_v9, %v672_v15  ;;  %v813_v23 = vsub.f32 %v679_v58, %v805_v48  ;;  %v825_v14 = vadd.f32 %v812_v47, %v811_v5 }
  0xa3   :  { %v818_v12 = vadd.f32 %v817_v11, %v810_v13 }
  0xa4   :  { %v814_v37 = vsub.f32 %v680_v17, %v806_v63  ;;  %v826_v52 = vadd.f32 %v825_v14, %v813_v23 }
  0xa5   :  { %v819_v25 = vrot.slane %v818_v12, 4 }
  0xa6   :  { %v827_v61 = vadd.f32 %v826_v52, %v814_v37 }
  0xa7   :  { %v820_v29 = vadd.f32 %v819_v25, %v818_v12 }
  0xa8   :  { %v828_v10 = vrot.slane %v827_v61, 4 }
  0xa9   :  { %v821_v54 = vrot.slane %v820_v29, 2 }
  0xaa   :  { %v829_v55 = vadd.f32 %v828_v10, %v827_v61 }
  0xab   :  { %v822_v0 = vadd.f32 %v821_v54, %v820_v29 }
  0xac   :  { %v830_v8 = vrot.slane %v829_v55, 2 }
  0xad   :  { %v823_v59 = vrot.slane %v822_v0, 1 }
  0xae   :  { %v831_v30 = vadd.f32 %v830_v8, %v829_v55 }
  0xaf   :  { %v824_v50 = vadd.f32 %v823_v59, %v822_v0 }
  0xb0   :  { %v832_v27 = vrot.slane %v831_v30, 1 }
  0xb2   :  { %v833_v21 = vadd.f32 %v832_v27, %v831_v30 }
  0xb4   :  { %v836_v6 = vsel %vm342_vm14, %v833_v21, %v824_v50 }
  0xb5   :  { %v838_v33 = vadd.f32 %v836_v6, %v815_v40 }
  0xb7   :  { %839 = vst [vmem:[%s2072_s5] sm:$0x3] %v838_v33 }

</bundles_post_ra>
